<compile_context>
chip_gen: v7x
topology: tpu7x:2x2x1
jax: 0.10.0
libtpu: 0.0.40
codegen_flags: <defaults>
</compile_context>

<pallas_src>
import functools

import jax
import jax.numpy as jnp
from jax import lax
from jax.experimental import pallas as pl
from jax.experimental.pallas import tpu as pltpu


# ---------------------------------------------------------------------------
# Fused backbone kernel:  conv1(3x3,s2,p1)+bias+ReLU  ->  conv2(3x3,s2,p1)+bias
# One image per grid step; the intermediate activation stays in VMEM scratch.
#
# Input layout (prepared host-side, see _prep_input):
#   x_ref[n, 1+m, 1+k, (r*4+s)*Cin + c] = image[n, c, 4*m + r, 4*k + s]
# i.e. a 4x4-phase polyphase (space-to-depth) repack with a one-row / one-col
# zero halo in front.  With this layout every tap of both strided 3x3 convs is
# a *static* slice, so each conv is a single MXU GEMM.
# ---------------------------------------------------------------------------
def _fused_backbone_kernel(x_ref, w1_ref, b1_ref, w2_ref, b2_ref, o_ref, y1_scr,
                           *, hq, wq, cin, c1):
    x = x_ref[0]                                   # (hq+1, wq+1, 16*cin) bf16

    # ---- conv1: GEMM rows ordered (phase_a, phase_b, u, v); cols (i, j, cin)
    lhs1_parts = []
    for a in range(2):
        for b in range(2):
            taps = []
            for i in range(3):
                t = 2 * a + i - 1                 # input-row offset in [-1, 3]
                r, e = t % 4, t // 4              # 4-phase index / shift (-1, 0)
                for j in range(3):
                    tt = 2 * b + j - 1
                    s, f = tt % 4, tt // 4
                    rs = r * 4 + s
                    taps.append(x[1 + e:1 + e + hq,
                                  1 + f:1 + f + wq,
                                  rs * cin:(rs + 1) * cin])        # (hq, wq, cin)
            part = jnp.concatenate(taps, axis=-1)                  # (hq, wq, 9*cin)
            lhs1_parts.append(part.reshape(hq * wq, 9 * cin))
    lhs1 = jnp.concatenate(lhs1_parts, axis=0)                     # (4*hq*wq, 9*cin)
    y1 = jnp.dot(lhs1, w1_ref[...], preferred_element_type=jnp.float32)
    y1 = jnp.maximum(y1 + b1_ref[...], 0.0)                        # bias + ReLU, f32

    # Stash conv1 output (2x2-phase polyphase of the half-res map) into a VMEM
    # scratch with a zero halo in front -> conv2 taps become static slices.
    y1_scr[...] = jnp.zeros_like(y1_scr)
    y1_scr[:, 1:, 1:, :] = y1.reshape(4, hq, wq, c1)

    # ---- conv2: GEMM rows ordered (u, v) == final patch order; cols (i, j, c1)
    taps2 = []
    for i in range(3):
        a, da = (i - 1) % 2, (i - 1) // 2          # phase / shift (-1 or 0)
        for j in range(3):
            b, db = (j - 1) % 2, (j - 1) // 2
            taps2.append(y1_scr[a * 2 + b,
                                1 + da:1 + da + hq,
                                1 + db:1 + db + wq, :])            # (hq, wq, c1)
    lhs2 = jnp.concatenate(taps2, axis=-1).reshape(hq * wq, 9 * c1)
    y2 = jnp.dot(lhs2.astype(jnp.bfloat16), w2_ref[...],
                 preferred_element_type=jnp.float32)
    o_ref[0] = (y2 + b2_ref[...]).astype(o_ref.dtype)              # (P, D)


# ---------------------------------------------------------------------------
# Host-side glue
# ---------------------------------------------------------------------------
def _prep_input(images_nchw):
    """NCHW -> front-padded 4x4-phase polyphase NHWC repack, cast to bf16.

    out[n, 1+m, 1+k, (r*4+s)*C + c] = images[n, c, 4*m + r, 4*k + s]
    """
    B, C, H, W = images_nchw.shape
    hq, wq = H // 4, W // 4
    x = jnp.transpose(images_nchw, (0, 2, 3, 1))          # NHWC
    x = x.reshape(B, hq, 4, wq, 4, C)                     # (n, m, r, k, s, c)
    x = x.transpose(0, 1, 3, 2, 4, 5)                     # (n, m, k, r, s, c)
    x = x.reshape(B, hq, wq, 16 * C)
    x = jnp.pad(x, ((0, 0), (1, 0), (1, 0), (0, 0)))
    return x.astype(jnp.bfloat16)


def _backbone_pallas(params, images_nchw):
    B, C, H, W = images_nchw.shape
    assert H % 4 == 0 and W % 4 == 0, "synthetic backbone needs H, W % 4 == 0"
    hq, wq = H // 4, W // 4
    c1 = params["w1"].shape[0]
    d = params["w2"].shape[0]
    p = hq * wq

    xprep = _prep_input(images_nchw)                      # (B, hq+1, wq+1, 16*C)
    # Weight matrices with rows ordered (kh, kw, cin) to match the kernel.
    w1_mat = params["w1"].transpose(2, 3, 1, 0).reshape(9 * C, c1).astype(jnp.bfloat16)
    w2_mat = params["w2"].transpose(2, 3, 1, 0).reshape(9 * c1, d).astype(jnp.bfloat16)
    b1 = params["b1"].reshape(1, c1).astype(jnp.float32)
    b2 = params["b2"].reshape(1, d).astype(jnp.float32)

    kernel = functools.partial(_fused_backbone_kernel,
                               hq=hq, wq=wq, cin=C, c1=c1)

    # TODO(synk): for real resnet-scale layers, add a K-reduction grid axis
    # ("arbitrary", last) with a VMEM accumulator and re-derive block sizes for
    # v7x's 64 MiB VMEM; at these shapes everything fits in a single block.
    return pl.pallas_call(
        kernel,
        out_shape=jax.ShapeDtypeStruct((B, p, d), jnp.float32),
        grid_spec=pltpu.PrefetchScalarGridSpec(
            num_scalar_prefetch=0,
            grid=(B,),
            in_specs=[
                pl.BlockSpec((1, hq + 1, wq + 1, 16 * C), lambda n: (n, 0, 0, 0)),
                pl.BlockSpec((9 * C, c1), lambda n: (0, 0)),
                pl.BlockSpec((1, c1), lambda n: (0, 0)),
                pl.BlockSpec((9 * c1, d), lambda n: (0, 0)),
                pl.BlockSpec((1, d), lambda n: (0, 0)),
            ],
            out_specs=pl.BlockSpec((1, p, d), lambda n: (n, 0, 0)),
            scratch_shapes=[pltpu.VMEM((4, hq + 1, wq + 1, c1), jnp.float32)],
        ),
        compiler_params=pltpu.CompilerParams(
            dimension_semantics=("parallel",),
            vmem_limit_bytes=32 * 1024 * 1024,
        ),
    )(xprep, w1_mat, b1, w2_mat, b2)


def init_params(key, cin=4, c1=32, d=128):
    k1, k2, k3, k4 = jax.random.split(key, 4)
    scale1 = 1.0 / jnp.sqrt(cin * 9)
    scale2 = 1.0 / jnp.sqrt(c1 * 9)
    return {
        "w1": jax.random.normal(k1, (c1, cin, 3, 3), jnp.float32) * scale1,
        "b1": jax.random.normal(k2, (c1,), jnp.float32) * 0.01,
        "w2": jax.random.normal(k3, (d, c1, 3, 3), jnp.float32) * scale2,
        "b2": jax.random.normal(k4, (d,), jnp.float32) * 0.01,
    }


def visual_extractor_forward(params, images):
    """images: (B, C, H, W) or (bs, 2, C, H, W) -> (B, P, D) or (bs, 2P, D)."""
    c, h, w = images.shape[-3:]
    bs = images.shape[0]
    iu_xray = images.ndim == 5
    if iu_xray:
        images = images.reshape(-1, c, h, w)
    patch_feats = _backbone_pallas(params, images)          # (B_total, P, D)
    if iu_xray:
        p, d = patch_feats.shape[-2:]
        # torch.cat((x[:, 0], x[:, 1]), dim=1) on contiguous views == reshape.
        patch_feats = patch_feats.reshape(bs, 2 * p, d)
    return patch_feats


# ---------------------------------------------------------------------------
# Plain-JAX reference (mirrors the kernel's bf16-operand / f32-accum precision)
# ---------------------------------------------------------------------------
def _reference_forward(params, images_nchw):
    f32 = jnp.float32
    x = jnp.transpose(images_nchw, (0, 2, 3, 1)).astype(jnp.bfloat16).astype(f32)
    w1 = params["w1"].transpose(2, 3, 1, 0).astype(jnp.bfloat16).astype(f32)
    w2 = params["w2"].transpose(2, 3, 1, 0).astype(jnp.bfloat16).astype(f32)
    dn = ("NHWC", "HWIO", "NHWC")
    y1 = lax.conv_general_dilated(x, w1, (2, 2), ((1, 1), (1, 1)),
                                  dimension_numbers=dn)
    y1 = jnp.maximum(y1 + params["b1"], 0.0)
    y1 = y1.astype(jnp.bfloat16).astype(f32)
    y2 = lax.conv_general_dilated(y1, w2, (2, 2), ((1, 1), (1, 1)),
                                  dimension_numbers=dn)
    y2 = y2 + params["b2"]
    B, hf, wf, d = y2.shape
    return y2.reshape(B, hf * wf, d)


if __name__ == "__main__":
    key = jax.random.PRNGKey(0)
    pkey, xkey, ykey = jax.random.split(key, 3)
    params = init_params(pkey)

    fwd = jax.jit(visual_extractor_forward)

    # 4-D case: (batch=2, channels=4, spatial=16x16) -> 4x4 patches, D=128.
    x = jax.random.normal(xkey, (2, 4, 16, 16), jnp.float32)
    out = jax.block_until_ready(fwd(params, x))
    assert out.shape == (2, 16, 128), out.shape

    ref = jax.block_until_ready(_reference_forward(params, x))
    err = float(jnp.max(jnp.abs(out - ref)))
    assert err < 1e-2, f"kernel/reference mismatch: max abs err = {err}"

    # 5-D iu_xray case: (bs=2, 2 views, 4, 16, 16) -> patches concatenated.
    x5 = jax.random.normal(ykey, (2, 2, 4, 16, 16), jnp.float32)
    out5 = jax.block_until_ready(fwd(params, x5))
    assert out5.shape == (2, 32, 128), out5.shape

    print("KERNEL_OK")
</pallas_src>

<mosaic_0001>
module attributes {stable_mosaic.version = 11 : i64} {
  func.func @_fused_backbone_kernel(%arg0: i32, %arg1: memref<1x5x5x64xbf16, #tpu.memory_space<vmem>>, %arg2: memref<36x32xbf16, #tpu.memory_space<vmem>>, %arg3: memref<1x32xf32, #tpu.memory_space<vmem>>, %arg4: memref<288x128xbf16, #tpu.memory_space<vmem>>, %arg5: memref<1x128xf32, #tpu.memory_space<vmem>>, %arg6: memref<1x16x128xf32, #tpu.memory_space<vmem>>, %arg7: memref<4x5x5x32xf32, #tpu.memory_space<vmem>>) attributes {dimension_semantics = [#tpu.dimension_semantics<parallel>], iteration_bounds = array<i64: 2>, scalar_prefetch = 0 : i64, scratch_operands = 1 : i64, tpu.core_type = #tpu.core_type<tc>, window_params = [{transform_indices = @transform_0, window_bounds = array<i64: 1, 5, 5, 64>}, {pipeline_mode = #tpu.pipeline_mode<synchronous>, transform_indices = @transform_1, window_bounds = array<i64: 36, 32>}, {pipeline_mode = #tpu.pipeline_mode<synchronous>, transform_indices = @transform_2, window_bounds = array<i64: 1, 32>}, {pipeline_mode = #tpu.pipeline_mode<synchronous>, transform_indices = @transform_3, window_bounds = array<i64: 288, 128>}, {pipeline_mode = #tpu.pipeline_mode<synchronous>, transform_indices = @transform_4, window_bounds = array<i64: 1, 128>}, {transform_indices = @transform_5, window_bounds = array<i64: 1, 16, 128>}]} {
    %c0 = arith.constant 0 : index
    %c0_0 = arith.constant 0 : index
    %c0_1 = arith.constant 0 : index
    %c0_2 = arith.constant 0 : index
    %0 = vector.load %arg1[%c0, %c0_0, %c0_1, %c0_2] : memref<1x5x5x64xbf16, #tpu.memory_space<vmem>>, vector<1x5x5x64xbf16>
    %1 = vector.shape_cast %0 : vector<1x5x5x64xbf16> to vector<5x5x64xbf16>
    %2 = vector.extract_strided_slice %1 {offsets = [0, 0, 60], sizes = [4, 4, 4], strides = [1, 1, 1]} : vector<5x5x64xbf16> to vector<4x4x4xbf16>
    %3 = vector.extract_strided_slice %1 {offsets = [0, 1, 48], sizes = [4, 4, 4], strides = [1, 1, 1]} : vector<5x5x64xbf16> to vector<4x4x4xbf16>
    %4 = vector.extract_strided_slice %1 {offsets = [0, 1, 52], sizes = [4, 4, 4], strides = [1, 1, 1]} : vector<5x5x64xbf16> to vector<4x4x4xbf16>
    %5 = vector.extract_strided_slice %1 {offsets = [1, 0, 12], sizes = [4, 4, 4], strides = [1, 1, 1]} : vector<5x5x64xbf16> to vector<4x4x4xbf16>
    %6 = vector.extract_strided_slice %1 {offsets = [1, 1, 0], sizes = [4, 4, 4], strides = [1, 1, 1]} : vector<5x5x64xbf16> to vector<4x4x4xbf16>
    %7 = vector.extract_strided_slice %1 {offsets = [1, 1, 4], sizes = [4, 4, 4], strides = [1, 1, 1]} : vector<5x5x64xbf16> to vector<4x4x4xbf16>
    %8 = vector.extract_strided_slice %1 {offsets = [1, 0, 28], sizes = [4, 4, 4], strides = [1, 1, 1]} : vector<5x5x64xbf16> to vector<4x4x4xbf16>
    %9 = vector.extract_strided_slice %1 {offsets = [1, 1, 16], sizes = [4, 4, 4], strides = [1, 1, 1]} : vector<5x5x64xbf16> to vector<4x4x4xbf16>
    %10 = vector.extract_strided_slice %1 {offsets = [1, 1, 20], sizes = [4, 4, 4], strides = [1, 1, 1]} : vector<5x5x64xbf16> to vector<4x4x4xbf16>
    %11 = tpu.concatenate %2, %3, %4, %5, %6, %7, %8, %9, %10 in 2 : vector<4x4x4xbf16>, vector<4x4x4xbf16>, vector<4x4x4xbf16>, vector<4x4x4xbf16>, vector<4x4x4xbf16>, vector<4x4x4xbf16>, vector<4x4x4xbf16>, vector<4x4x4xbf16>, vector<4x4x4xbf16> -> vector<4x4x36xbf16>
    %12 = vector.shape_cast %11 : vector<4x4x36xbf16> to vector<16x36xbf16>
    %13 = vector.extract_strided_slice %1 {offsets = [0, 1, 52], sizes = [4, 4, 4], strides = [1, 1, 1]} : vector<5x5x64xbf16> to vector<4x4x4xbf16>
    %14 = vector.extract_strided_slice %1 {offsets = [0, 1, 56], sizes = [4, 4, 4], strides = [1, 1, 1]} : vector<5x5x64xbf16> to vector<4x4x4xbf16>
    %15 = vector.extract_strided_slice %1 {offsets = [0, 1, 60], sizes = [4, 4, 4], strides = [1, 1, 1]} : vector<5x5x64xbf16> to vector<4x4x4xbf16>
    %16 = vector.extract_strided_slice %1 {offsets = [1, 1, 4], sizes = [4, 4, 4], strides = [1, 1, 1]} : vector<5x5x64xbf16> to vector<4x4x4xbf16>
    %17 = vector.extract_strided_slice %1 {offsets = [1, 1, 8], sizes = [4, 4, 4], strides = [1, 1, 1]} : vector<5x5x64xbf16> to vector<4x4x4xbf16>
    %18 = vector.extract_strided_slice %1 {offsets = [1, 1, 12], sizes = [4, 4, 4], strides = [1, 1, 1]} : vector<5x5x64xbf16> to vector<4x4x4xbf16>
    %19 = vector.extract_strided_slice %1 {offsets = [1, 1, 20], sizes = [4, 4, 4], strides = [1, 1, 1]} : vector<5x5x64xbf16> to vector<4x4x4xbf16>
    %20 = vector.extract_strided_slice %1 {offsets = [1, 1, 24], sizes = [4, 4, 4], strides = [1, 1, 1]} : vector<5x5x64xbf16> to vector<4x4x4xbf16>
    %21 = vector.extract_strided_slice %1 {offsets = [1, 1, 28], sizes = [4, 4, 4], strides = [1, 1, 1]} : vector<5x5x64xbf16> to vector<4x4x4xbf16>
    %22 = tpu.concatenate %13, %14, %15, %16, %17, %18, %19, %20, %21 in 2 : vector<4x4x4xbf16>, vector<4x4x4xbf16>, vector<4x4x4xbf16>, vector<4x4x4xbf16>, vector<4x4x4xbf16>, vector<4x4x4xbf16>, vector<4x4x4xbf16>, vector<4x4x4xbf16>, vector<4x4x4xbf16> -> vector<4x4x36xbf16>
    %23 = vector.shape_cast %22 : vector<4x4x36xbf16> to vector<16x36xbf16>
    %24 = vector.extract_strided_slice %1 {offsets = [1, 0, 28], sizes = [4, 4, 4], strides = [1, 1, 1]} : vector<5x5x64xbf16> to vector<4x4x4xbf16>
    %25 = vector.extract_strided_slice %1 {offsets = [1, 1, 16], sizes = [4, 4, 4], strides = [1, 1, 1]} : vector<5x5x64xbf16> to vector<4x4x4xbf16>
    %26 = vector.extract_strided_slice %1 {offsets = [1, 1, 20], sizes = [4, 4, 4], strides = [1, 1, 1]} : vector<5x5x64xbf16> to vector<4x4x4xbf16>
    %27 = vector.extract_strided_slice %1 {offsets = [1, 0, 44], sizes = [4, 4, 4], strides = [1, 1, 1]} : vector<5x5x64xbf16> to vector<4x4x4xbf16>
    %28 = vector.extract_strided_slice %1 {offsets = [1, 1, 32], sizes = [4, 4, 4], strides = [1, 1, 1]} : vector<5x5x64xbf16> to vector<4x4x4xbf16>
    %29 = vector.extract_strided_slice %1 {offsets = [1, 1, 36], sizes = [4, 4, 4], strides = [1, 1, 1]} : vector<5x5x64xbf16> to vector<4x4x4xbf16>
    %30 = vector.extract_strided_slice %1 {offsets = [1, 0, 60], sizes = [4, 4, 4], strides = [1, 1, 1]} : vector<5x5x64xbf16> to vector<4x4x4xbf16>
    %31 = vector.extract_strided_slice %1 {offsets = [1, 1, 48], sizes = [4, 4, 4], strides = [1, 1, 1]} : vector<5x5x64xbf16> to vector<4x4x4xbf16>
    %32 = vector.extract_strided_slice %1 {offsets = [1, 1, 52], sizes = [4, 4, 4], strides = [1, 1, 1]} : vector<5x5x64xbf16> to vector<4x4x4xbf16>
    %33 = tpu.concatenate %24, %25, %26, %27, %28, %29, %30, %31, %32 in 2 : vector<4x4x4xbf16>, vector<4x4x4xbf16>, vector<4x4x4xbf16>, vector<4x4x4xbf16>, vector<4x4x4xbf16>, vector<4x4x4xbf16>, vector<4x4x4xbf16>, vector<4x4x4xbf16>, vector<4x4x4xbf16> -> vector<4x4x36xbf16>
    %34 = vector.shape_cast %33 : vector<4x4x36xbf16> to vector<16x36xbf16>
    %35 = vector.extract_strided_slice %1 {offsets = [1, 1, 20], sizes = [4, 4, 4], strides = [1, 1, 1]} : vector<5x5x64xbf16> to vector<4x4x4xbf16>
    %36 = vector.extract_strided_slice %1 {offsets = [1, 1, 24], sizes = [4, 4, 4], strides = [1, 1, 1]} : vector<5x5x64xbf16> to vector<4x4x4xbf16>
    %37 = vector.extract_strided_slice %1 {offsets = [1, 1, 28], sizes = [4, 4, 4], strides = [1, 1, 1]} : vector<5x5x64xbf16> to vector<4x4x4xbf16>
    %38 = vector.extract_strided_slice %1 {offsets = [1, 1, 36], sizes = [4, 4, 4], strides = [1, 1, 1]} : vector<5x5x64xbf16> to vector<4x4x4xbf16>
    %39 = vector.extract_strided_slice %1 {offsets = [1, 1, 40], sizes = [4, 4, 4], strides = [1, 1, 1]} : vector<5x5x64xbf16> to vector<4x4x4xbf16>
    %40 = vector.extract_strided_slice %1 {offsets = [1, 1, 44], sizes = [4, 4, 4], strides = [1, 1, 1]} : vector<5x5x64xbf16> to vector<4x4x4xbf16>
    %41 = vector.extract_strided_slice %1 {offsets = [1, 1, 52], sizes = [4, 4, 4], strides = [1, 1, 1]} : vector<5x5x64xbf16> to vector<4x4x4xbf16>
    %42 = vector.extract_strided_slice %1 {offsets = [1, 1, 56], sizes = [4, 4, 4], strides = [1, 1, 1]} : vector<5x5x64xbf16> to vector<4x4x4xbf16>
    %43 = vector.extract_strided_slice %1 {offsets = [1, 1, 60], sizes = [4, 4, 4], strides = [1, 1, 1]} : vector<5x5x64xbf16> to vector<4x4x4xbf16>
    %44 = tpu.concatenate %35, %36, %37, %38, %39, %40, %41, %42, %43 in 2 : vector<4x4x4xbf16>, vector<4x4x4xbf16>, vector<4x4x4xbf16>, vector<4x4x4xbf16>, vector<4x4x4xbf16>, vector<4x4x4xbf16>, vector<4x4x4xbf16>, vector<4x4x4xbf16>, vector<4x4x4xbf16> -> vector<4x4x36xbf16>
    %45 = vector.shape_cast %44 : vector<4x4x36xbf16> to vector<16x36xbf16>
    %46 = tpu.concatenate %12, %23, %34, %45 in 0 : vector<16x36xbf16>, vector<16x36xbf16>, vector<16x36xbf16>, vector<16x36xbf16> -> vector<64x36xbf16>
    %c0_3 = arith.constant 0 : index
    %c0_4 = arith.constant 0 : index
    %47 = vector.load %arg2[%c0_3, %c0_4] : memref<36x32xbf16, #tpu.memory_space<vmem>>, vector<36x32xbf16>
    %cst = arith.constant dense<0.000000e+00> : vector<64x32xf32>
    %48 = tpu.matmul %46, %47, %cst {dimension_numbers = #tpu.dot_dimension_numbers<[1], [0], [0], [1], [0, 0, 1, 1], [], []>} : vector<64x36xbf16>, vector<36x32xbf16>, vector<64x32xf32> -> vector<64x32xf32>
    %c0_5 = arith.constant 0 : index
    %c0_6 = arith.constant 0 : index
    %49 = vector.load %arg3[%c0_5, %c0_6] : memref<1x32xf32, #tpu.memory_space<vmem>>, vector<1x32xf32>
    %50 = vector.broadcast %49 : vector<1x32xf32> to vector<64x32xf32>
    %51 = arith.addf %48, %50 : vector<64x32xf32>
    %cst_7 = arith.constant 0.000000e+00 : f32
    %52 = vector.broadcast %cst_7 : f32 to vector<64x32xf32>
    %53 = arith.maximumf %51, %52 : vector<64x32xf32>
    %cst_8 = arith.constant 0.000000e+00 : f32
    %54 = vector.broadcast %cst_8 : f32 to vector<4x5x5x32xf32>
    %c0_9 = arith.constant 0 : index
    %c0_10 = arith.constant 0 : index
    %c0_11 = arith.constant 0 : index
    %c0_12 = arith.constant 0 : index
    %55 = vector.load %arg7[%c0_9, %c0_10, %c0_11, %c0_12] : memref<4x5x5x32xf32, #tpu.memory_space<vmem>>, vector<4x5x5x32xf32>
    tpu.vector_store %arg7[%c0_9, %c0_10, %c0_11, %c0_12], %54 {strides = array<i32>} : memref<4x5x5x32xf32, #tpu.memory_space<vmem>>, vector<4x5x5x32xf32>,
    %56 = vector.shape_cast %53 : vector<64x32xf32> to vector<4x4x4x32xf32>
    %c0_13 = arith.constant 0 : index
    %c1 = arith.constant 1 : index
    %c1_14 = arith.constant 1 : index
    %c0_15 = arith.constant 0 : index
    %57 = vector.load %arg7[%c0_13, %c1, %c1_14, %c0_15] : memref<4x5x5x32xf32, #tpu.memory_space<vmem>>, vector<4x4x4x32xf32>
    tpu.vector_store %arg7[%c0_13, %c1, %c1_14, %c0_15], %56 {strides = array<i32>} : memref<4x5x5x32xf32, #tpu.memory_space<vmem>>, vector<4x4x4x32xf32>,
    %c3 = arith.constant 3 : index
    %c0_16 = arith.constant 0 : index
    %c0_17 = arith.constant 0 : index
    %c0_18 = arith.constant 0 : index
    %58 = vector.load %arg7[%c3, %c0_16, %c0_17, %c0_18] : memref<4x5x5x32xf32, #tpu.memory_space<vmem>>, vector<1x4x4x32xf32>
    %59 = vector.shape_cast %58 : vector<1x4x4x32xf32> to vector<4x4x32xf32>
    %c2 = arith.constant 2 : index
    %c0_19 = arith.constant 0 : index
    %c1_20 = arith.constant 1 : index
    %c0_21 = arith.constant 0 : index
    %60 = vector.load %arg7[%c2, %c0_19, %c1_20, %c0_21] : memref<4x5x5x32xf32, #tpu.memory_space<vmem>>, vector<1x4x4x32xf32>
    %61 = vector.shape_cast %60 : vector<1x4x4x32xf32> to vector<4x4x32xf32>
    %c3_22 = arith.constant 3 : index
    %c0_23 = arith.constant 0 : index
    %c1_24 = arith.constant 1 : index
    %c0_25 = arith.constant 0 : index
    %62 = vector.load %arg7[%c3_22, %c0_23, %c1_24, %c0_25] : memref<4x5x5x32xf32, #tpu.memory_space<vmem>>, vector<1x4x4x32xf32>
    %63 = vector.shape_cast %62 : vector<1x4x4x32xf32> to vector<4x4x32xf32>
    %c1_26 = arith.constant 1 : index
    %c1_27 = arith.constant 1 : index
    %c0_28 = arith.constant 0 : index
    %c0_29 = arith.constant 0 : index
    %64 = vector.load %arg7[%c1_26, %c1_27, %c0_28, %c0_29] : memref<4x5x5x32xf32, #tpu.memory_space<vmem>>, vector<1x4x4x32xf32>
    %65 = vector.shape_cast %64 : vector<1x4x4x32xf32> to vector<4x4x32xf32>
    %c0_30 = arith.constant 0 : index
    %c1_31 = arith.constant 1 : index
    %c1_32 = arith.constant 1 : index
    %c0_33 = arith.constant 0 : index
    %66 = vector.load %arg7[%c0_30, %c1_31, %c1_32, %c0_33] : memref<4x5x5x32xf32, #tpu.memory_space<vmem>>, vector<1x4x4x32xf32>
    %67 = vector.shape_cast %66 : vector<1x4x4x32xf32> to vector<4x4x32xf32>
    %c1_34 = arith.constant 1 : index
    %c1_35 = arith.constant 1 : index
    %c1_36 = arith.constant 1 : index
    %c0_37 = arith.constant 0 : index
    %68 = vector.load %arg7[%c1_34, %c1_35, %c1_36, %c0_37] : memref<4x5x5x32xf32, #tpu.memory_space<vmem>>, vector<1x4x4x32xf32>
    %69 = vector.shape_cast %68 : vector<1x4x4x32xf32> to vector<4x4x32xf32>
    %c3_38 = arith.constant 3 : index
    %c1_39 = arith.constant 1 : index
    %c0_40 = arith.constant 0 : index
    %c0_41 = arith.constant 0 : index
    %70 = vector.load %arg7[%c3_38, %c1_39, %c0_40, %c0_41] : memref<4x5x5x32xf32, #tpu.memory_space<vmem>>, vector<1x4x4x32xf32>
    %71 = vector.shape_cast %70 : vector<1x4x4x32xf32> to vector<4x4x32xf32>
    %c2_42 = arith.constant 2 : index
    %c1_43 = arith.constant 1 : index
    %c1_44 = arith.constant 1 : index
    %c0_45 = arith.constant 0 : index
    %72 = vector.load %arg7[%c2_42, %c1_43, %c1_44, %c0_45] : memref<4x5x5x32xf32, #tpu.memory_space<vmem>>, vector<1x4x4x32xf32>
    %73 = vector.shape_cast %72 : vector<1x4x4x32xf32> to vector<4x4x32xf32>
    %c3_46 = arith.constant 3 : index
    %c1_47 = arith.constant 1 : index
    %c1_48 = arith.constant 1 : index
    %c0_49 = arith.constant 0 : index
    %74 = vector.load %arg7[%c3_46, %c1_47, %c1_48, %c0_49] : memref<4x5x5x32xf32, #tpu.memory_space<vmem>>, vector<1x4x4x32xf32>
    %75 = vector.shape_cast %74 : vector<1x4x4x32xf32> to vector<4x4x32xf32>
    %76 = tpu.concatenate %59, %61, %63, %65, %67, %69, %71, %73, %75 in 2 : vector<4x4x32xf32>, vector<4x4x32xf32>, vector<4x4x32xf32>, vector<4x4x32xf32>, vector<4x4x32xf32>, vector<4x4x32xf32>, vector<4x4x32xf32>, vector<4x4x32xf32>, vector<4x4x32xf32> -> vector<4x4x288xf32>
    %77 = vector.shape_cast %76 : vector<4x4x288xf32> to vector<16x288xf32>
    %78 = arith.truncf %77 : vector<16x288xf32> to vector<16x288xbf16>
    %c0_50 = arith.constant 0 : index
    %c0_51 = arith.constant 0 : index
    %79 = vector.load %arg4[%c0_50, %c0_51] : memref<288x128xbf16, #tpu.memory_space<vmem>>, vector<288x128xbf16>
    %cst_52 = arith.constant dense<0.000000e+00> : vector<16x128xf32>
    %80 = tpu.matmul %78, %79, %cst_52 {dimension_numbers = #tpu.dot_dimension_numbers<[1], [0], [0], [1], [0, 0, 1, 1], [], []>} : vector<16x288xbf16>, vector<288x128xbf16>, vector<16x128xf32> -> vector<16x128xf32>
    %c0_53 = arith.constant 0 : index
    %c0_54 = arith.constant 0 : index
    %81 = vector.load %arg5[%c0_53, %c0_54] : memref<1x128xf32, #tpu.memory_space<vmem>>, vector<1x128xf32>
    %82 = vector.broadcast %81 : vector<1x128xf32> to vector<16x128xf32>
    %83 = arith.addf %80, %82 : vector<16x128xf32>
    %c0_55 = arith.constant 0 : index
    %c0_56 = arith.constant 0 : index
    %c0_57 = arith.constant 0 : index
    %84 = vector.load %arg6[%c0_55, %c0_56, %c0_57] : memref<1x16x128xf32, #tpu.memory_space<vmem>>, vector<1x16x128xf32>
    %85 = vector.shape_cast %84 : vector<1x16x128xf32> to vector<16x128xf32>
    %86 = vector.shape_cast %83 : vector<16x128xf32> to vector<1x16x128xf32>
    tpu.vector_store %arg6[%c0_55, %c0_56, %c0_57], %86 {strides = array<i32>} : memref<1x16x128xf32, #tpu.memory_space<vmem>>, vector<1x16x128xf32>,
    return
  }
  func.func @transform_0(%arg0: i32) -> (i32, i32, i32, i32) {
    %c0_i32 = arith.constant 0 : i32
    %c0_i32_0 = arith.constant 0 : i32
    %c0_i32_1 = arith.constant 0 : i32
    %c0_i32_2 = arith.constant 0 : i32
    return %arg0, %c0_i32, %c0_i32_0, %c0_i32_1 : i32, i32, i32, i32
  }
  func.func @transform_1(%arg0: i32) -> (i32, i32) {
    %c0_i32 = arith.constant 0 : i32
    %c0_i32_0 = arith.constant 0 : i32
    %c0_i32_1 = arith.constant 0 : i32
    return %c0_i32, %c0_i32_0 : i32, i32
  }
  func.func @transform_2(%arg0: i32) -> (i32, i32) {
    %c0_i32 = arith.constant 0 : i32
    %c0_i32_0 = arith.constant 0 : i32
    %c0_i32_1 = arith.constant 0 : i32
    return %c0_i32, %c0_i32_0 : i32, i32
  }
  func.func @transform_3(%arg0: i32) -> (i32, i32) {
    %c0_i32 = arith.constant 0 : i32
    %c0_i32_0 = arith.constant 0 : i32
    %c0_i32_1 = arith.constant 0 : i32
    return %c0_i32, %c0_i32_0 : i32, i32
  }
  func.func @transform_4(%arg0: i32) -> (i32, i32) {
    %c0_i32 = arith.constant 0 : i32
    %c0_i32_0 = arith.constant 0 : i32
    %c0_i32_1 = arith.constant 0 : i32
    return %c0_i32, %c0_i32_0 : i32, i32
  }
  func.func @transform_5(%arg0: i32) -> (i32, i32, i32) {
    %c0_i32 = arith.constant 0 : i32
    %c0_i32_0 = arith.constant 0 : i32
    %c0_i32_1 = arith.constant 0 : i32
    return %arg0, %c0_i32, %c0_i32_0 : i32, i32, i32
  }
}

</mosaic_0001>

<bundles_post_ra>
// kernel: visual_extractor_forward.1
= control target key start
LH: loop header
LB: loop body
LE: loop exit
PB: predicated region body
PF: predicated region fallthrough
CT: control target
= control target key end

     0   :  { %10 = vsyncpa [#allocation4], 0  ;;  %s2459_s0 = inlined_call_operand.vmem [shape: bf16[2,5,5,64], index: 0, kind: input, shape index: {}]   ;;  %s2460_s1 = inlined_call_operand.vmem [shape: bf16[36,32], index: 1, kind: input, shape index: {}]   ;;  %s2461_s2 = inlined_call_operand.vmem [shape: f32[1,32], index: 2, kind: input, shape index: {}]   ;;  %s2462_s3 = inlined_call_operand.vmem [shape: bf16[288,128], index: 3, kind: input, shape index: {}]   ;;  %s2463_s4 = inlined_call_operand.vmem [shape: f32[1,128], index: 4, kind: input, shape index: {}]   ;;  %s2464_s5 = inlined_call_operand.hbm [shape: f32[2,16,128], index: 5, kind: output, shape index: {}]  }
   0x1   :  { %12 = vsyncpa [#allocation4 + $0x1], 0  ;;  %s1867_s18 = smov 0   ;;  %s1869_s19 = smov 0  }
   0x2   :  { %s1871_s20 = smov 0   ;;  %s1873_s21 = smov 0  }
   0x3 LB: > { %s1888_s22 = sadd.s32 4294967295, %s1813_s21   ;;  %s1558_s23 = sadd.s32 4294967294, %s1813_s21   ;;  %s1813_s21 = sphi %s1873_s21, %s2474_s21   ;;  %s1809_s20 = sphi %s1871_s20, %s2473_s20   ;;  %s1805_s19 = sphi %s1869_s19, %s2472_s19   ;;  %s1801_s18 = sphi %s1867_s18, %s2471_s18  }
   0x4   : > { %s1892_s24 = sadd.s32 1, %s1813_s21   ;;  %s135_s25 = sadd.s32 1, %s1809_s20 }
   0x5   : > { %s132_s26 = ssub.s32 %s1813_s21, %s1892_s24  ;;  %p145_p0 = scmp.ne.s32.totalorder %s1809_s20, %s1805_s19 }
   0x6   : > { %p133_p1 = scmp.eq.s32.totalorder %s132_s26, 0  ;;  %p146_p2 = scmp.eq.s32.totalorder %s1888_s22, 1 }
   0x7   : > { %p151_p3 = scmp.ne.s32.totalorder %s1805_s19, %s1801_s18  ;;  %p152_p4 = scmp.eq.s32.totalorder %s1558_s23, 1 }
   0x8   : > { %s1903_s27 = scalar_select %p133_p1, %s1809_s20, %s135_s25  }
   0x9   : > { %p1905_p5 = por %p146_p2, %p145_p0  ;;  %p1909_p6 = por %p152_p4, %p151_p3 }
   0xa   : > { %p1561_p7 = scmp.ge.s32.totalorder %s1813_s21, 1  ;;  %p190_p8 = scmp.lt.s32.totalorder %s1813_s21, 3 }
   0xc   : > { %p191_p9 = pnand %p1561_p7, %p190_p8 }
   0xd   : > { %p218_p10 = scmp.lt.s32.totalorder (!%p191_p9), %s1888_s22, 1  ;;  %s1815_s10 = smov (!%p191_p9), 76   ;;  %v1728_v29 = vld [vmem:[%s2460_s1] sm:$0xff] (!%p191_p9)   ;;  %v1729_v30 = vld [vmem:[%s2460_s1 + $0x8] sm:$0xff] (!%p191_p9)   ;;  %vm910_vm0 = vcmask (!%p191_p9), 1041408   ;;  %vm337_vm1 = vcmask (!%p191_p9), 97280   ;;  %v454_v41 = vlaneseq (!%p191_p9) }
   0xe   : > { %194 = sbr.rel (%p191_p9) target bundleno = 890 (0x37a), region = 40  ;;  %s1816_s11 = smov (!%p191_p9), 8   ;;  %1639 = vmatprep.subr.bf16.mxu0 (!%p191_p9), %v1728_v29  ;;  %v1730_v31 = vld [vmem:[%s2460_s1 + $0x10] ss:$0 sps:$4 sm:$0x33] (!%p191_p9)   ;;  %vm346_vm2 = vcmask (!%p191_p9), 130048  }
   0xf   : > { %s1817_s12 = smov (!%p191_p9), 4   ;;  %s1818_s13 = smov (!%p191_p9), 68   ;;  %1640 = vmatpush3.bf16.msra.mxu0 (!%p191_p9), %v1728_v29  ;;  %v912_v32 = vsel (!%p191_p9), %vm910_vm0, %v1730_v31, 0  ;;  %vm355_vm3 = vcmask (!%p191_p9), 162816   ;;  %v1830_v39 = vmov (!%p191_p9), 1983009808  }
  0x10   : > { %s1819_s14 = smov (!%p191_p9), 84   ;;  %s1820_s15 = smov (!%p191_p9), 108   ;;  %1641 = vmatprep.subr.bf16.mxu0 (!%p191_p9), %v1729_v30  ;;  %v452_v40 = vunpack.c.l.s4 (!%p191_p9), %v1830_v39  ;;  %v455_v51 = vshrl.u32 (!%p191_p9), %v454_v41, 7  ;;  %vm360_vm4 = vcmask (!%p191_p9), 195584   ;;  %vm369_vm5 = vcmask (!%p191_p9), 228352  }
  0x11   : > { %s1821_s16 = smov (!%p191_p9), 104   ;;  %s1822_s17 = smov (!%p191_p9), 16   ;;  %vm378_vm6 = vcmask (!%p191_p9), 261120   ;;  %vm483_vm7 = vsmask.f32 (!%p191_p9), 1280  ;;  %vm319_vm14 = vcmask (!%p191_p9), 31744  }
  0x12   : > { %s1823_s23 = smov (!%p191_p9), 100   ;;  %v453_v50 = vunpack.c.0.s8 (!%p191_p9), %v452_v40  ;;  %vm484_vm8 = vsmask.f32 (!%p191_p9), 3336  ;;  %vm486_vm10 = vsmask.f32 (!%p191_p9), 5392  ;;  %vm332_vm15 = vcmask (!%p191_p9), 64512  }
  0x13   : > { %1642 = vmatpush3.bf16.msra.mxu0 (!%p191_p9), %v1729_v30  ;;  %vm2070_vm9 = vmor (!%p191_p9), %vm483_vm7, %vm484_vm8  ;;  %vm488_vm11 = vsmask.f32 (!%p191_p9), 7448  ;;  %s1606_s7 = sshll.u32 (!%p191_p9), %s1888_s22, 8 }
  0x14   : > { %1661 = vmatprep.subr.msk.bf16.mxu0 (!%p191_p9), %vm910_vm0, %v1730_v31  ;;  %v2054_v54 = vsub.s32 (!%p191_p9), %v453_v50, %v455_v51  ;;  %vm487_vm12 = vmor (!%p191_p9), %vm2070_vm9, %vm486_vm10  ;;  %vm897_vm0 = vcmask (!%p191_p9), 293888  }
  0x15   : > { %s219_s30 = scalar_select %p218_p10, %s1888_s22, 1  ;;  %vm2088_vm13 = vmor %vm487_vm12, %vm488_vm11 }
  0x16   : > { %s1835_s22 = smov [#allocation3]  }
  0x17   : > { %s1662_s6 = smul.u32 20, %s219_s30  ;;  %s1824_s30 = smov 124   ;;  %1644 = vmatpush3.bf16.msra.mxu0 %v912_v32 }
  0x19   : > { %s222_s9 = scalar_lea.vmem %s2459_s0, %s1662_s6 }
  0x1a   : > { %v1920_v0 = vld [vmem:[%s222_s9 + $0x8] sm:$0x7]  ;;  %v1922_v1 = vld [vmem:[%s222_s9 + $0xc] sm:$0x7]  ;;  %v1928_v4 = vld [vmem:[%s222_s9 + $0x4] sm:$0x7] }
  0x1b   : > { %v1926_v2 = vcombine.low %v1920_v0, %v1920_v0  ;;  %v1724_v3 = vld [vmem:[%s222_s9] ss:$0 sps:$4 sm:$0x77]   ;;  %v1933_v5 = vcombine.low %v1922_v1, %v1922_v1  ;;  %v1937_v6 = vcombine.low %v1928_v4, %v1928_v4  ;;  %v1941_v7 = vld [vmem:[%s222_s9 + $0x10] sm:$0x7] }
  0x1c   : > { %383 = vrot.lane.b32.xlu0 %v1724_v3, %s1815_s10  ;;  %v1949_v8 = vcombine.low %v1941_v7, %v1941_v7  ;;  %v252_v10 = vshll.u32 %v1724_v3, 16  ;;  %v250_v12 = vshrl.u32 %v1724_v3, 16 }
  0x1d   : > { %387 = vrot.lane.b32.xlu1 %v1926_v2, %s1815_s10  ;;  %v259_v9 = vshll.u32 %v1937_v6, 16  ;;  %v257_v11 = vshrl.u32 %v1937_v6, 16  ;;  %v273_v15 = vshll.u32 %v1933_v5, 16  ;;  %v266_v16 = vshll.u32 %v1926_v2, 16 }
  0x1e   : > { %v254_v14 = vrot.slane %v252_v10, 1  ;;  %v271_v17 = vshrl.u32 %v1933_v5, 16  ;;  %v264_v18 = vshrl.u32 %v1926_v2, 16  ;;  %v291_v25 = vshll.u32 %v1949_v8, 16 }
  0x1f   : > { %v261_v13 = vrot.slane %v259_v9, 1  ;;  %v275_v21 = vrot.slane %v273_v15, 1  ;;  %v268_v22 = vrot.slane %v266_v16, 1  ;;  %v289_v26 = vshrl.u32 %v1949_v8, 16 }
  0x20   : > { %385 = vrot.lane.b32.xlu0 %v1937_v6, %s1815_s10  ;;  %v255_v20 = vor.u32 %v254_v14, %v250_v12  ;;  %v293_v27 = vrot.slane %v291_v25, 1 }
  0x21   : > { %389 = vrot.lane.b32.xlu1 %v1933_v5, %s1815_s10  ;;  %v1968_v19 = vor.u32 %v261_v13, %v257_v11  ;;  %v1971_v23 = vor.u32 %v275_v21, %v271_v17  ;;  %v1973_v24 = vor.u32 %v268_v22, %v264_v18  ;;  %s1825_s10 = smov 12  }
  0x22   : > { %v1993_v28 = vor.u32 %v293_v27, %v289_v26 }
  0x24   : > { %391 = vrot.lane.b32.xlu0 %v1937_v6, %s1816_s11 }
  0x25   : > { %393 = vrot.lane.b32.xlu1 %v1926_v2, %s1816_s11 }
  0x28   : > { %395 = vrot.lane.b32.xlu0 %v1933_v5, %s1816_s11 }
  0x29   : > { %397 = vrot.lane.b32.xlu1 %v1949_v8, %s1816_s11 }
  0x2c   : > { %399 = vrot.lane.b32.xlu0 %v1937_v6, %s1817_s12 }
  0x2d   : > { %401 = vrot.lane.b32.xlu1 %v1926_v2, %s1817_s12 }
  0x30   : > { %403 = vrot.lane.b32.xlu0 %v1933_v5, %s1817_s12 }
  0x31   : > { %405 = vrot.lane.b32.xlu1 %v1949_v8, %s1817_s12  ;;  %s1826_s12 = smov 116  }
  0x34   : > { %241 = vrot.lane.b32.xlu0 %v1724_v3, %s1818_s13 }
  0x35   : > { %243 = vrot.lane.b32.xlu1 %v1937_v6, %s1818_s13 }
  0x38   : > { %245 = vrot.lane.b32.xlu0 %v1926_v2, %s1818_s13 }
  0x39   : > { %247 = vrot.lane.b32.xlu1 %v1933_v5, %s1818_s13  ;;  %s1827_s13 = smov 96  }
  0x3c   : > { %277 = vrot.lane.b32.xlu0 %v255_v20, %s1819_s14 }
  0x3d   : > { %279 = vrot.lane.b32.xlu1 %v1968_v19, %s1819_s14 }
  0x40   : > { %281 = vrot.lane.b32.xlu0 %v1973_v24, %s1819_s14 }
  0x41   : > { %283 = vrot.lane.b32.xlu1 %v1971_v23, %s1819_s14  ;;  %s1828_s14 = smov 112  }
  0x44   : > { %650 = vrot.lane.b32.xlu0 %v1937_v6, %s1820_s15 }
  0x45   : > { %652 = vrot.lane.b32.xlu1 %v1926_v2, %s1820_s15 }
  0x48   : > { %654 = vrot.lane.b32.xlu0 %v1933_v5, %s1820_s15 }
  0x49   : > { %656 = vrot.lane.b32.xlu1 %v1949_v8, %s1820_s15 }
  0x4c   : > { %658 = vrot.lane.b32.xlu0 %v1937_v6, %s1821_s16 }
  0x4d   : > { %660 = vrot.lane.b32.xlu1 %v1926_v2, %s1821_s16 }
  0x50   : > { %662 = vrot.lane.b32.xlu0 %v1933_v5, %s1821_s16 }
  0x51   : > { %664 = vrot.lane.b32.xlu1 %v1949_v8, %s1821_s16  ;;  %s1829_s16 = smov 92  }
  0x54   : > { %295 = vrot.lane.b32.xlu0 %v1968_v19, %s1822_s17 }
  0x55   : > { %297 = vrot.lane.b32.xlu1 %v1973_v24, %s1822_s17 }
  0x58   : > { %299 = vrot.lane.b32.xlu0 %v1971_v23, %s1822_s17 }
  0x59   : > { %301 = vrot.lane.b32.xlu1 %v1993_v28, %s1822_s17  ;;  %s1833_s17 = smov 64  }
  0x5c   : > { %546 = vrot.lane.b32.xlu0 %v1937_v6, %s1823_s23 }
  0x5d   : > { %548 = vrot.lane.b32.xlu1 %v1926_v2, %s1823_s23 }
  0x60   : > { %550 = vrot.lane.b32.xlu0 %v1933_v5, %s1823_s23 }
  0x61   : > { %552 = vrot.lane.b32.xlu1 %v1949_v8, %s1823_s23 }
  0x64   : > { %303 = vrot.lane.b32.xlu0 %v1937_v6, %s1824_s30 }
  0x65   : > { %305 = vrot.lane.b32.xlu1 %v1926_v2, %s1824_s30 }
  0x68   : > { %307 = vrot.lane.b32.xlu0 %v1933_v5, %s1824_s30 }
  0x69   : > { %309 = vrot.lane.b32.xlu1 %v1949_v8, %s1824_s30 }
  0x6c   : > { %311 = vrot.lane.b32.xlu0 %v1968_v19, %s1825_s10 }
  0x6d   : > { %313 = vrot.lane.b32.xlu1 %v1973_v24, %s1825_s10 }
  0x70   : > { %315 = vrot.lane.b32.xlu0 %v1971_v23, %s1825_s10 }
  0x71   : > { %317 = vrot.lane.b32.xlu1 %v1993_v28, %s1825_s10  ;;  %s2415_s10 = scalar_lea.hbm %s2464_s5, %s1606_s7 }
  0x74   : > { %554 = vrot.lane.b32.xlu0 %v1968_v19, %s1826_s12 }
  0x75   : > { %556 = vrot.lane.b32.xlu1 %v1973_v24, %s1826_s12 }
  0x78   : > { %558 = vrot.lane.b32.xlu0 %v1971_v23, %s1826_s12 }
  0x79   : > { %560 = vrot.lane.b32.xlu1 %v1993_v28, %s1826_s12 }
  0x7c   : > { %562 = vrot.lane.b32.xlu0 %v1937_v6, %s1827_s13 }
  0x7d   : > { %564 = vrot.lane.b32.xlu1 %v1926_v2, %s1827_s13 }
  0x80   : > { %566 = vrot.lane.b32.xlu0 %v1933_v5, %s1827_s13 }
  0x81   : > { %568 = vrot.lane.b32.xlu1 %v1949_v8, %s1827_s13 }
  0x84   : > { %570 = vrot.lane.b32.xlu0 %v1968_v19, %s1828_s14 }
  0x85   : > { %572 = vrot.lane.b32.xlu1 %v1973_v24, %s1828_s14 }
  0x88   : > { %574 = vrot.lane.b32.xlu0 %v1971_v23, %s1828_s14 }
  0x89   : > { %576 = vrot.lane.b32.xlu1 %v1993_v28, %s1828_s14 }
  0x8c   : > { %578 = vrot.lane.b32.xlu0 %v1937_v6, %s1829_s16 }
  0x8d   : > { %580 = vrot.lane.b32.xlu1 %v1926_v2, %s1829_s16 }
  0x8e   : > { %v384_v34 = vpop.permute.xlu0 %383 }
  0x8f   : > { %v388_v33 = vpop.permute.xlu1 %387 }
  0x90   : > { %582 = vrot.lane.b32.xlu0 %v1933_v5, %s1829_s16 }
  0x91   : > { %584 = vrot.lane.b32.xlu1 %v1949_v8, %s1829_s16  ;;  %s1755_s16 = sshll.u32 %s1835_s22, 4  ;;  %s1756_s16 = int_to_ptr.vmem [resolvable:$false] %s1755_s16 }
  0x92   : > { %v386_v36 = vpop.permute.xlu0 %385  ;;  %s1757_s23 = scalar_lea.vmem %s1756_s16, 512 }
  0x93   : > { %v390_v35 = vpop.permute.xlu1 %389 }
  0x94   : > { %586 = vrot.lane.b32.xlu0 %v1968_v19, %s1820_s15 }
  0x95   : > { %588 = vrot.lane.b32.xlu1 %v1973_v24, %s1820_s15 }
  0x96   : > { %v392_v38 = vpop.permute.xlu0 %391 }
  0x97   : > { %v394_v37 = vpop.permute.xlu1 %393  ;;  %v416_v43 = vsel %vm337_vm1, %v384_v34, %v392_v38 }
  0x98   : > { %v418_v42 = vsel %vm337_vm1, %v386_v36, %v394_v37  ;;  %v423_v45 = vsel %vm346_vm2, %v416_v43, %v392_v38  ;;  %590 = vrot.lane.b32.xlu0 %v1971_v23, %s1820_s15 }
  0x99   : > { %v424_v44 = vsel %vm346_vm2, %v418_v42, %v394_v37  ;;  %592 = vrot.lane.b32.xlu1 %v1993_v28, %s1820_s15  ;;  %v427_v47 = vsel %vm355_vm3, %v423_v45, %v392_v38  ;;  %s1832_s15 = smov 32  }
  0x9a   : > { %v428_v46 = vsel %vm355_vm3, %v424_v44, %v394_v37  ;;  %v396_v49 = vpop.permute.xlu0 %395 }
  0x9b   : > { %v398_v48 = vpop.permute.xlu1 %397  ;;  %v420_v53 = vsel %vm337_vm1, %v388_v33, %v396_v49 }
  0x9c   : > { %v422_v52 = vsel %vm337_vm1, %v390_v35, %v398_v48  ;;  %v425_v58 = vsel %vm346_vm2, %v420_v53, %v396_v49 }
  0x9d   : > { %v426_v57 = vsel %vm346_vm2, %v422_v52, %v398_v48  ;;  %v429_v5 = vsel %vm355_vm3, %v425_v58, %v396_v49 }
  0x9e   : > { %v400_v56 = vpop.permute.xlu0 %399  ;;  %v430_v3 = vsel %vm355_vm3, %v426_v57, %v398_v48 }
  0x9f   : > { %v402_v55 = vpop.permute.xlu1 %401  ;;  %v432_v60 = vsel %vm360_vm4, %v427_v47, %v400_v56 }
  0xa0   : > { %v434_v59 = vsel %vm360_vm4, %v428_v46, %v402_v55  ;;  %v439_v62 = vsel %vm369_vm5, %v432_v60, %v400_v56 }
  0xa1   : > { %v440_v61 = vsel %vm369_vm5, %v434_v59, %v402_v55  ;;  %v443_v2 = vsel %vm378_vm6, %v439_v62, %v400_v56 }
  0xa2   : > { %v444_v63 = vsel %vm378_vm6, %v440_v61, %v402_v55  ;;  %v457_v8 = vrot.slane %v443_v2, %v2054_v54  ;;  %v404_v10 = vpop.permute.xlu0 %403 }
  0xa3   : > { %v465_v6 = vrot.slane %v444_v63, %v2054_v54  ;;  %v406_v9 = vpop.permute.xlu1 %405  ;;  %v436_v12 = vsel %vm360_vm4, %v429_v5, %v404_v10 }
  0xa4   : > { %v438_v11 = vsel %vm360_vm4, %v430_v3, %v406_v9  ;;  %v458_v17 = vcombine.high %v457_v8, %v457_v8  ;;  %v491_v18 = vshrl.u32 %v457_v8, 16  ;;  %v494_v19 = vshll.u32 %v457_v8, 16 }
  0xa5   : > { %v466_v14 = vcombine.high %v465_v6, %v465_v6  ;;  %v505_v15 = vshrl.u32 %v465_v6, 16  ;;  %v508_v16 = vshll.u32 %v465_v6, 16  ;;  %v442_v20 = vsel %vm369_vm5, %v438_v11, %v406_v9 }
  0xa6   : > { %v441_v21 = vsel %vm369_vm5, %v436_v12, %v404_v10  ;;  %v500_v25 = vshll.u32 %v458_v17, 16  ;;  %v2078_v27 = vpop.permute.xlu0 %241  ;;  %v493_v28 = vrot.slane %v491_v18, 6  ;;  %v496_v29 = vrot.slane %v494_v19, 7 }
  0xa7   : > { %v507_v22 = vrot.slane %v505_v15, 6  ;;  %v510_v23 = vrot.slane %v508_v16, 7  ;;  %v514_v24 = vshll.u32 %v466_v14, 16  ;;  %v2076_v26 = vpop.permute.xlu1 %243  ;;  %v446_v30 = vsel %vm378_vm6, %v442_v20, %v406_v9 }
  0xa8   : > { %v445_v31 = vsel %vm378_vm6, %v441_v21, %v404_v10  ;;  %v481_v33 = vrot.slane %v446_v30, %v2054_v54  ;;  %v497_v35 = vor.u32 %v496_v29, %v493_v28  ;;  %v502_v36 = vrot.slane %v500_v25, 7 }
  0xa9   : > { %v511_v32 = vor.u32 %v510_v23, %v507_v22  ;;  %v516_v34 = vrot.slane %v514_v24, 7  ;;  %v473_v37 = vrot.slane %v445_v31, %v2054_v54 }
  0xaa   : > { %v482_v40 = vcombine.high %v481_v33, %v481_v33  ;;  %v533_v41 = vshrl.u32 %v481_v33, 16  ;;  %v536_v42 = vshll.u32 %v481_v33, 16  ;;  %v246_v44 = vpop.permute.xlu0 %245  ;;  %v498_v45 = vrot.slane %v497_v35, 2 }
  0xab   : > { %v512_v39 = vrot.slane %v511_v32, 2  ;;  %v248_v43 = vpop.permute.xlu1 %247  ;;  %v474_v46 = vcombine.high %v473_v37, %v473_v37  ;;  %v519_v47 = vshrl.u32 %v473_v37, 16  ;;  %v522_v48 = vshll.u32 %v473_v37, 16 }
  0xac   : > { %v535_v49 = vrot.slane %v533_v41, 6  ;;  %v538_v50 = vrot.slane %v536_v42, 7  ;;  %v542_v51 = vshll.u32 %v482_v40, 16  ;;  %v503_v57 = vsel %vm2088_vm13, %v498_v45, %v502_v36 }
  0xad   : > { %v517_v52 = vsel %vm2088_vm13, %v512_v39, %v516_v34  ;;  %v521_v53 = vrot.slane %v519_v47, 6  ;;  %v524_v55 = vrot.slane %v522_v48, 7  ;;  %v528_v56 = vshll.u32 %v474_v46, 16 }
  0xae   : > { %v539_v58 = vor.u32 %v538_v50, %v535_v49  ;;  %v278_v60 = vpop.permute.xlu0 %277  ;;  %v815_v61 = vcombine.low %v503_v57, %v517_v52  ;;  %v544_v2 = vrot.slane %v542_v51, 7 }
  0xaf   : > { %v280_v59 = vpop.permute.xlu1 %279  ;;  %v525_v62 = vor.u32 %v524_v55, %v521_v53  ;;  %v530_v5 = vrot.slane %v528_v56, 7  ;;  %v322_v34 = vsel %vm319_vm14, %v2078_v27, %v278_v60 }
  0xb0   : > { %v540_v63 = vrot.slane %v539_v58, 2  ;;  %v2101_v14 = vrot.slane %v815_v61, %v2054_v54  ;;  %v325_v33 = vsel %vm319_vm14, %v2076_v26, %v280_v59  ;;  %v333_v45 = vsel %vm332_vm15, %v322_v34, %v278_v60 }
  0xb1   : > { %v526_v3 = vrot.slane %v525_v62, 2  ;;  %v334_v37 = vsel %vm332_vm15, %v325_v33, %v280_v59  ;;  %v339_v52 = vsel %vm337_vm1, %v333_v45, %v1928_v4 }
  0xb2   : > { %v282_v8 = vpop.permute.xlu0 %281  ;;  %v545_v9 = vsel %vm2088_vm13, %v540_v63, %v544_v2  ;;  %v341_v46 = vsel %vm337_vm1, %v334_v37, %v1920_v0 }
  0xb3   : > { %v284_v6 = vpop.permute.xlu1 %283  ;;  %v531_v10 = vsel %vm2088_vm13, %v526_v3, %v530_v5  ;;  %v328_v40 = vsel %vm319_vm14, %v246_v44, %v282_v8 }
  0xb4   : > { %v816_v11 = vcombine.low %v531_v10, %v545_v9  ;;  %v331_v39 = vsel %vm319_vm14, %v248_v43, %v284_v6  ;;  %v335_v27 = vsel %vm332_vm15, %v328_v40, %v282_v8 }
  0xb5   : > { %v336_v26 = vsel %vm332_vm15, %v331_v39, %v284_v6  ;;  %v343_v56 = vsel %vm337_vm1, %v335_v27, %v1922_v1 }
  0xb6   : > { %v651_v13 = vpop.permute.xlu0 %650  ;;  %v2104_v15 = vrot.slane %v816_v11, %v2054_v54  ;;  %v345_v55 = vsel %vm337_vm1, %v336_v26, %v1941_v7 }
  0xb7   : > { %v653_v12 = vpop.permute.xlu1 %652 }
  0xb8   : > { %v831_v16 = vcombine.low %v2101_v14, %v2104_v15 }
  0xba   : > { %v655_v18 = vpop.permute.xlu0 %654 }
  0xbb   : > { %v657_v17 = vpop.permute.xlu1 %656 }
  0xbe   : > { %v659_v20 = vpop.permute.xlu0 %658 }
  0xbf   : > { %v661_v19 = vpop.permute.xlu1 %660  ;;  %v675_v22 = vsel %vm337_vm1, %v651_v13, %v659_v20 }
  0xc0   : > { %v677_v21 = vsel %vm337_vm1, %v653_v12, %v661_v19  ;;  %v682_v24 = vsel %vm346_vm2, %v675_v22, %v659_v20 }
  0xc1   : > { %v683_v23 = vsel %vm346_vm2, %v677_v21, %v661_v19  ;;  %v686_v28 = vsel %vm355_vm3, %v682_v24, %v659_v20 }
  0xc2   : > { %v687_v25 = vsel %vm355_vm3, %v683_v23, %v661_v19  ;;  %v663_v30 = vpop.permute.xlu0 %662 }
  0xc3   : > { %v665_v29 = vpop.permute.xlu1 %664  ;;  %v679_v42 = vsel %vm337_vm1, %v655_v18, %v663_v30 }
  0xc4   : > { %v681_v41 = vsel %vm337_vm1, %v657_v17, %v665_v29  ;;  %v684_v44 = vsel %vm346_vm2, %v679_v42, %v663_v30 }
  0xc5   : > { %v685_v43 = vsel %vm346_vm2, %v681_v41, %v665_v29  ;;  %v688_v59 = vsel %vm355_vm3, %v684_v44, %v663_v30 }
  0xc6   : > { %v296_v32 = vpop.permute.xlu0 %295  ;;  %v689_v4 = vsel %vm355_vm3, %v685_v43, %v665_v29 }
  0xc7   : > { %v298_v31 = vpop.permute.xlu1 %297  ;;  %v348_v63 = vsel %vm346_vm2, %v339_v52, %v296_v32 }
  0xc8   : > { %v350_v51 = vsel %vm346_vm2, %v341_v46, %v298_v31  ;;  %v356_v17 = vsel %vm355_vm3, %v348_v63, %v296_v32 }
  0xc9   : > { %v357_v1 = vsel %vm355_vm3, %v350_v51, %v298_v31 }
  0xca   : > { %v2120_v36 = vpop.permute.xlu0 %299 }
  0xcb   : > { %v2118_v35 = vpop.permute.xlu1 %301  ;;  %v352_v33 = vsel %vm346_vm2, %v343_v56, %v2120_v36 }
  0xcc   : > { %v354_v29 = vsel %vm346_vm2, %v345_v55, %v2118_v35 }
  0xce   : > { %v2134_v48 = vpop.permute.xlu0 %546 }
  0xcf   : > { %v2132_v47 = vpop.permute.xlu1 %548  ;;  %v690_v50 = vsel %vm360_vm4, %v686_v28, %v2134_v48 }
  0xd0   : > { %v691_v49 = vsel %vm360_vm4, %v687_v25, %v2132_v47  ;;  %v694_v53 = vsel %vm369_vm5, %v690_v50, %v2134_v48 }
  0xd1   : > { %v695_v0 = vsel %vm369_vm5, %v691_v49, %v2132_v47  ;;  %v698_v58 = vsel %vm378_vm6, %v694_v53, %v2134_v48 }
  0xd2   : > { %v699_v57 = vsel %vm378_vm6, %v695_v0, %v2132_v47  ;;  %v712_v61 = vrot.slane %v698_v58, %v2054_v54  ;;  %v2163_v7 = vpop.permute.xlu0 %550 }
  0xd3   : > { %v720_v60 = vrot.slane %v699_v57, %v2054_v54  ;;  %v2161_v62 = vpop.permute.xlu1 %552  ;;  %v692_v3 = vsel %vm360_vm4, %v688_v59, %v2163_v7 }
  0xd4   : > { %v693_v2 = vsel %vm360_vm4, %v689_v4, %v2161_v62  ;;  %v713_v9 = vcombine.high %v712_v61, %v712_v61  ;;  %v739_v10 = vshrl.u32 %v712_v61, 16  ;;  %v742_v11 = vshll.u32 %v712_v61, 16 }
  0xd5   : > { %v721_v5 = vcombine.high %v720_v60, %v720_v60  ;;  %v753_v6 = vshrl.u32 %v720_v60, 16  ;;  %v756_v8 = vshll.u32 %v720_v60, 16  ;;  %v697_v12 = vsel %vm369_vm5, %v693_v2, %v2161_v62 }
  0xd6   : > { %v696_v13 = vsel %vm369_vm5, %v692_v3, %v2163_v7  ;;  %v304_v22 = vpop.permute.xlu0 %303  ;;  %v741_v23 = vrot.slane %v739_v10, 6  ;;  %v744_v24 = vrot.slane %v742_v11, 7  ;;  %v701_v25 = vsel %vm378_vm6, %v697_v12, %v2161_v62 }
  0xd7   : > { %v755_v18 = vrot.slane %v753_v6, 6  ;;  %v758_v19 = vrot.slane %v756_v8, 7  ;;  %v762_v20 = vshll.u32 %v721_v5, 16  ;;  %v306_v21 = vpop.permute.xlu1 %305  ;;  %v700_v28 = vsel %vm378_vm6, %v696_v13, %v2163_v7 }
  0xd8   : > { %v748_v31 = vshll.u32 %v713_v9, 16  ;;  %v736_v32 = vrot.slane %v701_v25, %v2054_v54  ;;  %v745_v37 = vor.u32 %v744_v24, %v741_v23  ;;  %v728_v39 = vrot.slane %v700_v28, %v2054_v54 }
  0xd9   : > { %v759_v30 = vor.u32 %v758_v19, %v755_v18  ;;  %v764_v34 = vrot.slane %v762_v20, 7  ;;  %v364_v57 = vsel %vm360_vm4, %v357_v1, %v306_v21  ;;  %v362_v4 = vsel %vm360_vm4, %v356_v17, %v304_v22 }
  0xda   : > { %v737_v41 = vcombine.high %v736_v32, %v736_v32  ;;  %v781_v42 = vshrl.u32 %v736_v32, 16  ;;  %v784_v45 = vshll.u32 %v736_v32, 16  ;;  %v308_v27 = vpop.permute.xlu0 %307  ;;  %v746_v46 = vrot.slane %v745_v37, 2 }
  0xdb   : > { %v760_v40 = vrot.slane %v759_v30, 2  ;;  %v310_v26 = vpop.permute.xlu1 %309  ;;  %v729_v43 = vcombine.high %v728_v39, %v728_v39  ;;  %v767_v44 = vshrl.u32 %v728_v39, 16  ;;  %v770_v49 = vshll.u32 %v728_v39, 16 }
  0xdc   : > { %v750_v50 = vrot.slane %v748_v31, 7  ;;  %v783_v51 = vrot.slane %v781_v42, 6  ;;  %v786_v52 = vrot.slane %v784_v45, 7  ;;  %v790_v0 = vshll.u32 %v737_v41, 16 }
  0xdd   : > { %v769_v53 = vrot.slane %v767_v44, 6  ;;  %v772_v55 = vrot.slane %v770_v49, 7  ;;  %v776_v56 = vshll.u32 %v729_v43, 16  ;;  %v765_v63 = vsel %vm2088_vm13, %v760_v40, %v764_v34 }
  0xde   : > { %v787_v58 = vor.u32 %v786_v52, %v783_v51  ;;  %v312_v60 = vpop.permute.xlu0 %311  ;;  %v751_v61 = vsel %vm2088_vm13, %v746_v46, %v750_v50  ;;  %v792_v2 = vrot.slane %v790_v0, 7  ;;  %v359_v11 = vsel %vm355_vm3, %v354_v29, %v2118_v35 }
  0xdf   : > { %v314_v59 = vpop.permute.xlu1 %313  ;;  %v773_v3 = vor.u32 %v772_v55, %v769_v53  ;;  %v371_v6 = vsel %vm369_vm5, %v362_v4, %v312_v60  ;;  %v853_v10 = vcombine.low %v751_v61, %v765_v63  ;;  %v358_v12 = vsel %vm355_vm3, %v352_v33, %v2120_v36 }
  0xe0   : > { %v373_v5 = vsel %vm369_vm5, %v364_v57, %v314_v59  ;;  %v788_v8 = vrot.slane %v787_v58, 2  ;;  %v379_v9 = vsel %vm378_vm6, %v371_v6, %v312_v60  ;;  %v778_v17 = vrot.slane %v776_v56, 7 }
  0xe1   : > { %v380_v1 = vsel %vm378_vm6, %v373_v5, %v314_v59  ;;  %v774_v13 = vrot.slane %v773_v3, 2  ;;  %v368_v18 = vsel %vm360_vm4, %v359_v11, %v310_v26  ;;  %v366_v19 = vsel %vm360_vm4, %v358_v12, %v308_v27 }
  0xe2   : > { %v316_v21 = vpop.permute.xlu0 %315  ;;  %v793_v22 = vsel %vm2088_vm13, %v788_v8, %v792_v2  ;;  %v798_v23 = vcombine.low %v379_v9, %v380_v1  ;;  %v2211_v33 = vrot.slane %v853_v10, %v2054_v54 }
  0xe3   : > { %v318_v20 = vpop.permute.xlu1 %317  ;;  %v375_v25 = vsel %vm369_vm5, %v366_v19, %v316_v21  ;;  %v779_v35 = vsel %vm2088_vm13, %v774_v13, %v778_v17 }
  0xe4   : > { %v377_v24 = vsel %vm369_vm5, %v368_v18, %v318_v20  ;;  %v381_v28 = vsel %vm378_vm6, %v375_v25, %v316_v21  ;;  %v854_v29 = vcombine.low %v779_v35, %v793_v22  ;;  %v806_v37 = vrot.slane %v798_v23, %v2054_v54 }
  0xe5   : > { %v382_v36 = vsel %vm378_vm6, %v377_v24, %v318_v20 }
  0xe6   : > { %v799_v30 = vcombine.low %v381_v28, %v382_v36  ;;  %v555_v32 = vpop.permute.xlu0 %554  ;;  %v2214_v34 = vrot.slane %v854_v29, %v2054_v54 }
  0xe7   : > { %v557_v31 = vpop.permute.xlu1 %556  ;;  %v596_v52 = vsel %vm319_vm14, %v2134_v48, %v555_v32 }
  0xe8   : > { %v813_v39 = vrot.slane %v799_v30, %v2054_v54  ;;  %v869_v38 = vcombine.low %v2211_v33, %v2214_v34  ;;  %v599_v51 = vsel %vm319_vm14, %v2132_v47, %v557_v31  ;;  %v606_v15 = vsel %vm332_vm15, %v596_v52, %v555_v32  ;;  %v1731_v33 = vld [vmem:[%s2462_s3 + $0x80] sm:$0xff]   ;;  %v1732_v34 = vld [vmem:[%s2462_s3 + $0x88] sm:$0xff]  }
  0xe9   : > { %v607_v14 = vsel %vm332_vm15, %v599_v51, %v557_v31  ;;  %v1831_v31 = vmov 0.0  }
  0xea   : > { %v814_v40 = vcombine.low %v806_v37, %v813_v39  ;;  %v559_v42 = vpop.permute.xlu0 %558  ;;  %1653 = vmatprep.subr.bf16.mxu0 %v1831_v31  ;;  %v1569_v37 = vld [vmem:[%s2461_s2] ss:$0 sm:$0xff] }
  0xeb   : > { %v561_v41 = vpop.permute.xlu1 %560  ;;  %v602_v55 = vsel %vm319_vm14, %v2163_v7, %v559_v42 }
  0xec   : > { %1645 = vmatprep.mubr.msk.bf16.mxu0 %vm897_vm0, %v814_v40  ;;  %v608_v60 = vsel %vm332_vm15, %v602_v55, %v559_v42 }
  0xed   : > { %1646 = vmatmul.mubr.msk.bf16.vlgmr.msra.gmra.mrb[0].mxu0 %vm897_vm0, %v831_v16  ;;  %v605_v16 = vsel %vm319_vm14, %v2161_v62, %v561_v41 }
  0xee   : > { %v563_v26 = vpop.permute.xlu0 %562  ;;  %v609_v59 = vsel %vm332_vm15, %v605_v16, %v561_v41  ;;  %1654 = vmatpush3.bf16.msra.mxu0 %v1731_v33 }
  0xef   : > { %v565_v45 = vpop.permute.xlu1 %564  ;;  %v611_v57 = vsel %vm337_vm1, %v606_v15, %v563_v26  ;;  %1655 = vmatprep.subr.bf16.mxu0 %v1831_v31 }
  0xf0   : > { %v613_v56 = vsel %vm337_vm1, %v607_v14, %v565_v45 }
  0xf2   : > { %v567_v46 = vpop.permute.xlu0 %566  ;;  %1656 = vmatpush3.bf16.msra.mxu0 %v1732_v34 }
  0xf3   : > { %v569_v27 = vpop.permute.xlu1 %568  ;;  %v615_v62 = vsel %vm337_vm1, %v608_v60, %v567_v46 }
  0xf4   : > { %v617_v61 = vsel %vm337_vm1, %v609_v59, %v569_v27  ;;  %vm987_vm1 = vcmask 258048  }
  0xf5   : > { %994 = vst.msk [vmem:[#allocation2 + $0x30] sm:$0x1f] %vm987_vm1, %v1831_v31  ;;  %995 = vst.msk [vmem:[#allocation2 + $0x38] sm:$0x1f] %vm987_vm1, %v1831_v31 }
  0xf6   : > { %v571_v44 = vpop.permute.xlu0 %570  ;;  %989 = vst.msk [vmem:[#allocation2 + $0x8] sm:$0x1f] %vm987_vm1, %v1831_v31  ;;  %990 = vst.msk [vmem:[#allocation2 + $0x10] sm:$0x1f] %vm987_vm1, %v1831_v31 }
  0xf7   : > { %v573_v43 = vpop.permute.xlu1 %572  ;;  %v619_v48 = vsel %vm346_vm2, %v611_v57, %v571_v44  ;;  %991 = vst.msk [vmem:[#allocation2 + $0x18] sm:$0x1f] %vm987_vm1, %v1831_v31  ;;  %992 = vst.msk [vmem:[#allocation2 + $0x20] sm:$0x1f] %vm987_vm1, %v1831_v31 }
  0xf8   : > { %v621_v47 = vsel %vm346_vm2, %v613_v56, %v573_v43  ;;  %v626_v63 = vsel %vm355_vm3, %v619_v48, %v571_v44  ;;  %996 = vst.msk [vmem:[#allocation2 + $0x40] sm:$0x1f] %vm987_vm1, %v1831_v31  ;;  %997 = vst.msk [vmem:[#allocation2 + $0x48] sm:$0x1f] %vm987_vm1, %v1831_v31 }
  0xf9   : > { %v627_v7 = vsel %vm355_vm3, %v621_v47, %v573_v43  ;;  %998 = vst.msk [vmem:[#allocation2 + $0x50] sm:$0x1f] %vm987_vm1, %v1831_v31  ;;  %999 = vst.msk [vmem:[#allocation2 + $0x58] sm:$0x1f] %vm987_vm1, %v1831_v31 }
  0xfa   : > { %v575_v50 = vpop.permute.xlu0 %574  ;;  %1000 = vst.msk [vmem:[#allocation2 + $0x60] sm:$0x1f] %vm987_vm1, %v1831_v31  ;;  %1001 = vst.msk [vmem:[#allocation2 + $0x68] sm:$0x1f] %vm987_vm1, %v1831_v31 }
  0xfb   : > { %v577_v49 = vpop.permute.xlu1 %576  ;;  %v623_v3 = vsel %vm346_vm2, %v615_v62, %v575_v50  ;;  %1002 = vst.msk [vmem:[#allocation2 + $0x70] sm:$0x1f] %vm987_vm1, %v1831_v31  ;;  %1003 = vst.msk [vmem:[#allocation2 + $0x78] sm:$0x1f] %vm987_vm1, %v1831_v31 }
  0xfc   : > { %v625_v2 = vsel %vm346_vm2, %v617_v61, %v577_v49  ;;  %v628_v17 = vsel %vm355_vm3, %v623_v3, %v575_v50  ;;  %1004 = vst.msk [vmem:[#allocation2 + $0x80] sm:$0x1f] %vm987_vm1, %v1831_v31  ;;  %1005 = vst.msk [vmem:[#allocation2 + $0x88] sm:$0x1f] %vm987_vm1, %v1831_v31  ;;  %vm1834_vm2 = vmmov 0  }
  0xfd   : > { %v629_v13 = vsel %vm355_vm3, %v625_v2, %v577_v49  ;;  %1006 = vst.msk [vmem:[#allocation2 + $0x90] sm:$0x1f] %vm987_vm1, %v1831_v31  ;;  %1007 = vst.msk [vmem:[#allocation2 + $0x98] sm:$0x1f] %vm987_vm1, %v1831_v31  ;;  %vm1033_vm3 = vcmask 257024  }
  0xfe   : > { %v579_v53 = vpop.permute.xlu0 %578 }
  0xff   : > { %v581_v0 = vpop.permute.xlu1 %580  ;;  %v631_v6 = vsel %vm360_vm4, %v626_v63, %v579_v53 }
 0x100   : > { %v633_v5 = vsel %vm360_vm4, %v627_v7, %v581_v0 }
 0x102   : > { %v583_v4 = vpop.permute.xlu0 %582  ;;  %v1060_v32 = vld [vmem:[#allocation2 + $0x79] sm:$0xf] }
 0x103   : > { %v585_v58 = vpop.permute.xlu1 %584  ;;  %v635_v19 = vsel %vm360_vm4, %v628_v17, %v583_v4 }
 0x104   : > { %v637_v18 = vsel %vm360_vm4, %v629_v13, %v585_v58  ;;  %vm1191_vm4 = vcmask 523264  }
 0x106   : > { %v587_v1 = vpop.permute.xlu0 %586 }
 0x107   : > { %v589_v8 = vpop.permute.xlu1 %588  ;;  %v639_v10 = vsel %vm369_vm5, %v631_v6, %v587_v1  ;;  %v1735_v6 = vld [vmem:[%s2462_s3 + $0x40] sm:$0xff]  }
 0x108   : > { %v641_v9 = vsel %vm369_vm5, %v633_v5, %v589_v8  ;;  %v646_v12 = vsel %vm378_vm6, %v639_v10, %v587_v1  ;;  %1614 = vmatprep.subr.bf16.mxu1 %v1735_v6  ;;  %v1737_v10 = vld [vmem:[%s2462_s3 + $0x48] sm:$0xff]  }
 0x109   : > { %v647_v11 = vsel %vm378_vm6, %v641_v9, %v589_v8  ;;  %v1736_v8 = vld [vmem:[%s2462_s3] sm:$0xff]  }
 0x10a   : > { %v591_v21 = vpop.permute.xlu0 %590  ;;  %v836_v22 = vcombine.low %v646_v12, %v647_v11  ;;  %1615 = vmatpush3.bf16.msra.mxu1 %v1736_v8  ;;  %v1738_v11 = vld [vmem:[%s2462_s3 + $0x8] sm:$0xff]   ;;  %v1739_v12 = vld [vmem:[%s2462_s3 + $0x50] sm:$0xff]  }
 0x10b   : > { %v593_v20 = vpop.permute.xlu1 %592  ;;  %v643_v24 = vsel %vm369_vm5, %v635_v19, %v591_v21  ;;  %1616 = vmatprep.subr.bf16.mxu1 %v1737_v10 }
 0x10c   : > { %v645_v23 = vsel %vm369_vm5, %v637_v18, %v593_v20  ;;  %v648_v35 = vsel %vm378_vm6, %v643_v24, %v591_v21  ;;  %v844_v28 = vrot.slane %v836_v22, %v2054_v54  ;;  %v1740_v18 = vld [vmem:[%s2462_s3 + $0x10] sm:$0xff]   ;;  %vm1196_vm5 = vcmask 785408  }
 0x10d   : > { %v649_v25 = vsel %vm378_vm6, %v645_v23, %v593_v20 }
 0x10e   : > { %v837_v36 = vcombine.low %v648_v35, %v649_v25  ;;  %1617 = vmatpush3.bf16.msra.mxu1 %v1738_v11  ;;  %v1741_v25 = vld [vmem:[%s2462_s3 + $0x58] sm:$0xff]  }
 0x10f   : > { %1618 = vmatprep.subr.bf16.mxu1 %v1739_v12 }
 0x110   : > { %v851_v29 = vrot.slane %v837_v36, %v2054_v54  ;;  %v1056_v54 = vld [vmem:[#allocation2 + $0x51] sm:$0xf]  ;;  %v1742_v36 = vld [vmem:[%s2462_s3 + $0x18] sm:$0xff]  }
 0x111   : > { %1095 = vrot.lane.b32.xlu0 %v1056_v54, %s1832_s15  ;;  %v1745_v54 = vld [vmem:[%s2462_s3 + $0x68] sm:$0xff]  }
 0x112   : > { %v852_v30 = vcombine.low %v844_v28, %v851_v29  ;;  %1619 = vmatpush3.bf16.msra.mxu1 %v1740_v18  ;;  %v1743_v28 = vld [vmem:[%s2462_s3 + $0x60] sm:$0xff]  }
 0x113   : > { %1620 = vmatprep.subr.bf16.mxu1 %v1741_v25  ;;  %v1744_v29 = vld [vmem:[%s2462_s3 + $0x20] sm:$0xff]  }
 0x114   : > { %1649 = vmatprep.mubr.msk.bf16.mxu0 %vm897_vm0, %v852_v30 }
 0x115   : > { %1650 = vmatmul.mubr.msk.bf16.gmra.mrb[4].mxu0 %vm897_vm0, %v869_v38  ;;  %1111 = vrot.lane.b32.xlu0 %v1060_v32, %s1833_s17  ;;  %v1746_v32 = vld [vmem:[%s2462_s3 + $0x28] sm:$0xff]  }
 0x116   : > { %1657 = vmatprep.mubr.msk.bf16.mxu0 %vm1834_vm2, %v1831_v31  ;;  %1621 = vmatpush3.bf16.msra.mxu1 %v1742_v36 }
 0x117   : > { %1622 = vmatprep.subr.bf16.mxu1 %v1743_v28 }
 0x11a   : > { %1623 = vmatpush3.bf16.msra.mxu1 %v1744_v29 }
 0x11b   : > { %1624 = vmatprep.subr.bf16.mxu1 %v1745_v54 }
 0x11e   : > { %1625 = vmatpush3.bf16.msra.mxu1 %v1746_v32 }
 0x1c0   : > { %v1647_v39 = vpop.f32.mrb[0].mxu0 }
 0x1c1   : > { %v957_v38 = vadd.f32 %v1647_v39, %v1569_v37  ;;  %v948_v40 = vpop.f32.mrb[1].mxu0  ;;  %v1748_v39 = vld [vmem:[%s2462_s3 + $0x30] sm:$0xff]  }
 0x1c2   : > { %v949_v41 = vadd.f32 %v1569_v37, %v948_v40  ;;  %v1648_v42 = vpop.f32.mrb[2].mxu0 }
 0x1c3   : > { %v981_v45 = vmax.f32 %v957_v38, 0.0  ;;  %v960_v26 = vadd.f32 %v1648_v42, %v1569_v37  ;;  %v951_v27 = vpop.f32.mrb[3].mxu0  ;;  %v1750_v42 = vld [vmem:[%s2462_s3 + $0x38] sm:$0xff]  }
 0x1c4   : > { %v979_v46 = vmax.f32 %v949_v41, 0.0  ;;  %v952_v43 = vadd.f32 %v1569_v37, %v951_v27  ;;  %v1749_v41 = vld [vmem:[%s2462_s3 + $0x78] sm:$0xff]  }
 0x1c5   : > { %v1018_v44 = vcombine.high %v981_v45, %v981_v45  ;;  %1038 = vst.msk [vmem:[#allocation2 + $0x31] sm:$0xf] %vm1033_vm3, %v981_v45  ;;  %v982_v49 = vmax.f32 %v960_v26, 0.0 }
 0x1c6   : > { %v1016_v50 = vcombine.high %v979_v46, %v979_v46  ;;  %1034 = vst.msk [vmem:[#allocation2 + $0x9] sm:$0xf] %vm1033_vm3, %v979_v46  ;;  %v980_v51 = vmax.f32 %v952_v43, 0.0  ;;  %v1096_v43 = vpop.permute.xlu0 %1095 }
 0x1c7   : > { %1039 = vst.msk [vmem:[#allocation2 + $0x39] sm:$0xf] %vm1033_vm3, %v1018_v44  ;;  %v1019_v52 = vcombine.high %v982_v49, %v982_v49  ;;  %1040 = vst.msk [vmem:[#allocation2 + $0x41] sm:$0xf] %vm1033_vm3, %v982_v49 }
 0x1c8   : > { %1035 = vst.msk [vmem:[#allocation2 + $0x11] sm:$0xf] %vm1033_vm3, %v1016_v50  ;;  %v1017_v0 = vcombine.high %v980_v51, %v980_v51  ;;  %1036 = vst.msk [vmem:[#allocation2 + $0x19] sm:$0xf] %vm1033_vm3, %v980_v51 }
 0x1c9   : > { %1041 = vst.msk [vmem:[#allocation2 + $0x49] sm:$0xf] %vm1033_vm3, %v1019_v52 }
 0x1ca   : > { %1037 = vst.msk [vmem:[#allocation2 + $0x21] sm:$0xf] %vm1033_vm3, %v1017_v0  ;;  %v1112_v44 = vpop.permute.xlu0 %1111 }
 0x1cc   : > { %v1073_v53 = vld [vmem:[#allocation2 + $0x31] sm:$0xf] }
 0x1cd   : > { %1143 = vrot.lane.b32.xlu0 %v1073_v53, %s1832_s15  ;;  %v1065_v15 = vld [vmem:[#allocation2 + $0x30] sm:$0xf] }
 0x1ce   : > { %v1074_v14 = vld [vmem:[#allocation2 + $0x39] sm:$0xf]  ;;  %v1075_v55 = vld [vmem:[#allocation2 + $0x41] sm:$0xf] }
 0x1cf   : > { %1145 = vrot.lane.b32.xlu1 %v1074_v14, %s1832_s15  ;;  %v1066_v16 = vld [vmem:[#allocation2 + $0x38] sm:$0xf]  ;;  %v1067_v26 = vld [vmem:[#allocation2 + $0x40] sm:$0xf] }
 0x1d0   : > { %v1076_v56 = vld [vmem:[#allocation2 + $0x49] sm:$0xf] }
 0x1d1   : > { %1127 = vrot.lane.b32.xlu0 %v1065_v15, %s1827_s13  ;;  %v1068_v46 = vld [vmem:[#allocation2 + $0x48] sm:$0xf] }
 0x1d3   : > { %1129 = vrot.lane.b32.xlu1 %v1066_v16, %s1827_s13 }
 0x1d5   : > { %1147 = vrot.lane.b32.xlu0 %v1075_v55, %s1832_s15 }
 0x1d7   : > { %1149 = vrot.lane.b32.xlu1 %v1076_v56, %s1832_s15 }
 0x1e8   : > { %v1651_v57 = vpop.f32.mrb[4].mxu0 }
 0x1e9   : > { %v973_v47 = vadd.f32 %v1651_v57, %v1569_v37  ;;  %v964_v48 = vpop.f32.mrb[5].mxu0 }
 0x1ea   : > { %v965_v58 = vadd.f32 %v1569_v37, %v964_v48  ;;  %v1652_v4 = vpop.f32.mrb[6].mxu0 }
 0x1eb   : > { %v985_v59 = vmax.f32 %v973_v47, 0.0  ;;  %v976_v60 = vadd.f32 %v1652_v4, %v1569_v37  ;;  %v967_v61 = vpop.f32.mrb[7].mxu0 }
 0x1ec   : > { %v983_v62 = vmax.f32 %v965_v58, 0.0  ;;  %v968_v7 = vadd.f32 %v1569_v37, %v967_v61  ;;  %v1747_v37 = vld [vmem:[%s2462_s3 + $0x70] sm:$0xff]  }
 0x1ed   : > { %v1022_v63 = vcombine.high %v985_v59, %v985_v59  ;;  %1046 = vst.msk [vmem:[#allocation2 + $0x81] sm:$0xf] %vm1033_vm3, %v985_v59  ;;  %v986_v2 = vmax.f32 %v976_v60, 0.0  ;;  %1626 = vmatprep.subr.bf16.mxu1 %v1747_v37  ;;  %v1051_v60 = vld [vmem:[#allocation2 + $0x78] sm:$0xf] }
 0x1ee   : > { %v1020_v3 = vcombine.high %v983_v62, %v983_v62  ;;  %1042 = vst.msk [vmem:[#allocation2 + $0x59] sm:$0xf] %vm1033_vm3, %v983_v62  ;;  %v984_v5 = vmax.f32 %v968_v7, 0.0  ;;  %1627 = vmatpush3.bf16.msra.mxu1 %v1748_v39  ;;  %v1070_v61 = vld [vmem:[#allocation2 + $0x11] sm:$0xf]  ;;  %v1187_v6 = vsel %vm378_vm6, %v1051_v60, %v1096_v43 }
 0x1ef   : > { %1047 = vst.msk [vmem:[#allocation2 + $0x89] sm:$0xf] %vm1033_vm3, %v1022_v63  ;;  %v1023_v1 = vcombine.high %v986_v2, %v986_v2  ;;  %1048 = vst.msk [vmem:[#allocation2 + $0x91] sm:$0xf] %vm1033_vm3, %v986_v2  ;;  %1628 = vmatprep.subr.bf16.mxu1 %v1749_v41  ;;  %v1069_v2 = vld [vmem:[#allocation2 + $0x9] sm:$0xf]  ;;  %v1192_v29 = vsel %vm1191_vm4, %v1187_v6, %v1112_v44 }
 0x1f0   : > { %1043 = vst.msk [vmem:[#allocation2 + $0x61] sm:$0xf] %vm1033_vm3, %v1020_v3  ;;  %v1021_v9 = vcombine.high %v984_v5, %v984_v5  ;;  %1044 = vst.msk [vmem:[#allocation2 + $0x69] sm:$0xf] %vm1033_vm3, %v984_v5 }
 0x1f1   : > { %1049 = vst.msk [vmem:[#allocation2 + $0x99] sm:$0xf] %vm1033_vm3, %v1023_v1  ;;  %v1071_v1 = vld [vmem:[#allocation2 + $0x19] sm:$0xf] }
 0x1f2   : > { %1045 = vst.msk [vmem:[#allocation2 + $0x71] sm:$0xf] %vm1033_vm3, %v1021_v9  ;;  %1629 = vmatpush3.bf16.msra.mxu1 %v1750_v42  ;;  %v1072_v9 = vld [vmem:[#allocation2 + $0x21] sm:$0xf] }
 0x1f4   : > { %v1078_v13 = vld [vmem:[#allocation2 + $0x80] sm:$0xf] }
 0x1f5   : > { %v1061_v17 = vld [vmem:[#allocation2 + $0x81] sm:$0xf]  ;;  %1159 = vrot.lane.b32.xlu0 %v1078_v13, %s1833_s17  ;;  %v1083_v19 = vld [vmem:[#allocation2 + $0x59] sm:$0xf] }
 0x1f6   : > { %1113 = vrot.lane.b32.xlu1 %v1061_v17, %s1833_s17  ;;  %v1057_v20 = vld [vmem:[#allocation2 + $0x59] sm:$0xf]  ;;  %v1733_v21 = vld [vmem:[#allocation2 + $0x81] ss:$8 sps:$4 sm:$0xff]   ;;  %v1080_v24 = vld [vmem:[#allocation2 + $0x90] sm:$0xf] }
 0x1f7   : > { %v1079_v35 = vld [vmem:[#allocation2 + $0x88] sm:$0xf]  ;;  %v1063_v31 = vld [vmem:[#allocation2 + $0x91] sm:$0xf]  ;;  %v1058_v34 = vld [vmem:[#allocation2 + $0x61] sm:$0xf] }
 0x1f8   : > { %v1734_v22 = vld [vmem:[#allocation2 + $0x91] ss:$8 sps:$4 sm:$0xff]   ;;  %v1062_v30 = vld [vmem:[#allocation2 + $0x89] sm:$0xf]  ;;  %v1084_v38 = vld [vmem:[#allocation2 + $0x61] sm:$0xf] }
 0x1f9   : > { %1175 = vrot.lane.b32.xlu0 %v1083_v19, %s1827_s13  ;;  %v1243_v23 = vpack.c.bf16 %v1734_v22, %v1733_v21  ;;  %v1059_v33 = vld [vmem:[#allocation2 + $0x69] sm:$0xf]  ;;  %v1081_v45 = vld [vmem:[#allocation2 + $0x98] sm:$0xf]  ;;  %v1086_v27 = vld [vmem:[#allocation2 + $0x71] sm:$0xf] }
 0x1fa   : > { %1097 = vrot.lane.b32.xlu1 %v1057_v20, %s1832_s15  ;;  %v1085_v40 = vld [vmem:[#allocation2 + $0x69] sm:$0xf]  ;;  %v1052_v62 = vld [vmem:[#allocation2 + $0x80] sm:$0xf]  ;;  %v1054_v21 = vld [vmem:[#allocation2 + $0x90] sm:$0xf] }
 0x1fb   : > { %1658 = vmatmul.mubr.msk.bf16.vlgmr.msra.gmra.mrb[8].mxu0 %vm378_vm6, %v1243_v23  ;;  %v1053_v22 = vld [vmem:[#allocation2 + $0x88] sm:$0xf] }
 0x1fd   : > { %1163 = vrot.lane.b32.xlu0 %v1080_v24, %s1833_s17 }
 0x1fe   : > { %1161 = vrot.lane.b32.xlu1 %v1079_v35, %s1833_s17 }
 0x201   : > { %1115 = vrot.lane.b32.xlu0 %v1062_v30, %s1833_s17 }
 0x202   : > { %1117 = vrot.lane.b32.xlu1 %v1063_v31, %s1833_s17 }
 0x205   : > { %1099 = vrot.lane.b32.xlu0 %v1058_v34, %s1832_s15 }
 0x206   : > { %1101 = vrot.lane.b32.xlu1 %v1059_v33, %s1832_s15 }
 0x209   : > { %1179 = vrot.lane.b32.xlu0 %v1085_v40, %s1827_s13 }
 0x20a   : > { %1177 = vrot.lane.b32.xlu1 %v1084_v38, %s1827_s13 }
 0x20d   : > { %1131 = vrot.lane.b32.xlu0 %v1067_v26, %s1827_s13 }
 0x20e   : > { %1165 = vrot.lane.b32.xlu1 %v1081_v45, %s1833_s17 }
 0x212   : > { %1181 = vrot.lane.b32.xlu1 %v1086_v27, %s1827_s13 }
 0x216   : > { %1133 = vrot.lane.b32.xlu1 %v1068_v46, %s1827_s13  ;;  %s215_s13 = sand.u32 1, %s1805_s19  }
 0x217   : > { %s1562_s15 = sshll.u32 %s215_s13, 4  ;;  %s2417_s12 = scalar_lea.sflag [#allocation4], %s215_s13 }
 0x218   : > { %s217_s30 = scalar_lea.vmem [#allocation3], %s1562_s15 }
 0x219   : > { %s1496_s6 = sshll.u32 %s217_s30, 4  ;;  %s2410_s6 = int_to_ptr.vmem [resolvable:$true] %s1496_s6 }
 0x21a   : > { %s1751_s14 = scalar_lea.vmem %s2410_s6, 256  ;;  %p1758_p0 = scmp.lt.s32.totalorder %s2410_s6, %s1756_s16 }
 0x21b   : > { %p1752_p11 = scmp.ne.s32.totalorder %s2410_s6, %s1751_s14  ;;  %p1759_p1 = scmp.lt.s32.totalorder %s1757_s23, %s1751_s14 }
 0x21d   : > { %p1753_p12 = pnand %p1752_p11, %p1905_p5  ;;  %p1760_p2 = por %p1759_p1, %p1758_p0 }
 0x21f   : > { %p1754_p13 = pneg %p1753_p12 }
 0x221   : > { %p1761_p3 = pnand %p1760_p2, %p1754_p13 }
 0x23f   : > { %v1144_v49 = vpop.permute.xlu0 %1143 }
 0x240   : > { %v1201_v8 = vsel %vm378_vm6, %v1069_v2, %v1144_v49 }
 0x241   : > { %v1146_v50 = vpop.permute.xlu1 %1145 }
 0x242   : > { %v1202_v3 = vsel %vm378_vm6, %v1070_v61, %v1146_v50  ;;  %v1581_v50 = vld [vmem:[%s2463_s4] ss:$0 sm:$0xff] }
 0x243   : > { %v1128_v51 = vpop.permute.xlu0 %1127 }
 0x244   : > { %v1197_v38 = vsel %vm1196_vm5, %v1192_v29, %v1128_v51 }
 0x245   : > { %v1130_v52 = vpop.permute.xlu1 %1129 }
 0x247   : > { %v1148_v0 = vpop.permute.xlu0 %1147 }
 0x248   : > { %v1203_v11 = vsel %vm378_vm6, %v1071_v1, %v1148_v0 }
 0x249   : > { %v1150_v53 = vpop.permute.xlu1 %1149 }
 0x24a   : > { %v1204_v12 = vsel %vm378_vm6, %v1072_v9, %v1150_v53 }
 0x267   : > { %v1160_v15 = vpop.permute.xlu0 %1159 }
 0x268   : > { %v1114_v14 = vpop.permute.xlu1 %1113  ;;  %v1205_v13 = vsel %vm1191_vm4, %v1201_v8, %v1160_v15 }
 0x26b   : > { %v1176_v55 = vpop.permute.xlu0 %1175 }
 0x26c   : > { %v1098_v16 = vpop.permute.xlu1 %1097  ;;  %v1209_v19 = vsel %vm1196_vm5, %v1205_v13, %v1176_v55 }
 0x26d   : > { %v1188_v5 = vsel %vm378_vm6, %v1052_v62, %v1098_v16 }
 0x26e   : > { %v1193_v18 = vsel %vm1191_vm4, %v1188_v5, %v1114_v14 }
 0x26f   : > { %v1164_v57 = vpop.permute.xlu0 %1163  ;;  %v1198_v32 = vsel %vm1196_vm5, %v1193_v18, %v1130_v52 }
 0x270   : > { %v1162_v56 = vpop.permute.xlu1 %1161  ;;  %v1207_v20 = vsel %vm1191_vm4, %v1203_v11, %v1164_v57  ;;  %v1577_v45 = vcombine.low %v1197_v38, %v1198_v32 }
 0x271   : > { %v1206_v10 = vsel %vm1191_vm4, %v1202_v3, %v1162_v56 }
 0x273   : > { %v1116_v48 = vpop.permute.xlu0 %1115 }
 0x274   : > { %v1118_v47 = vpop.permute.xlu1 %1117 }
 0x277   : > { %v1100_v4 = vpop.permute.xlu0 %1099 }
 0x278   : > { %v1102_v58 = vpop.permute.xlu1 %1101  ;;  %v1189_v35 = vsel %vm378_vm6, %v1053_v22, %v1100_v4 }
 0x279   : > { %v1190_v25 = vsel %vm378_vm6, %v1054_v21, %v1102_v58  ;;  %v1194_v33 = vsel %vm1191_vm4, %v1189_v35, %v1116_v48 }
 0x27a   : > { %v1195_v34 = vsel %vm1191_vm4, %v1190_v25, %v1118_v47 }
 0x27b   : > { %v1180_v7 = vpop.permute.xlu0 %1179 }
 0x27c   : > { %v1178_v59 = vpop.permute.xlu1 %1177  ;;  %v1211_v36 = vsel %vm1196_vm5, %v1207_v20, %v1180_v7 }
 0x27d   : > { %v1210_v17 = vsel %vm1196_vm5, %v1206_v10, %v1178_v59 }
 0x27e   : > { %v1578_v31 = vcombine.low %v1209_v19, %v1210_v17 }
 0x27f   : > { %v1132_v30 = vpop.permute.xlu0 %1131 }
 0x280   : > { %v1166_v63 = vpop.permute.xlu1 %1165  ;;  %v1199_v40 = vsel %vm1196_vm5, %v1194_v33, %v1132_v30 }
 0x281   : > { %v1208_v23 = vsel %vm1191_vm4, %v1204_v12, %v1166_v63 }
 0x284   : > { %v1182_v24 = vpop.permute.xlu1 %1181 }
 0x285   : > { %v1212_v28 = vsel %vm1196_vm5, %v1208_v23, %v1182_v24 }
 0x286   : > { %v1580_v54 = vcombine.low %v1211_v36, %v1212_v28 }
 0x288   : > { %v1134_v37 = vpop.permute.xlu1 %1133  ;;  %v1242_v39 = vpack.c.bf16 %v1580_v54, %v1578_v31 }
 0x289   : > { %v1200_v41 = vsel %vm1196_vm5, %v1195_v34, %v1134_v37 }
 0x28a   : > { %v1579_v42 = vcombine.low %v1199_v40, %v1200_v41  ;;  %1430 = vmatprep.mubr.bf16.mxu1 %v1242_v39 }
 0x28c   : > { %v1241_v26 = vpack.c.bf16 %v1579_v42, %v1577_v45 }
 0x28e   : > { %1431 = vmatmul.mubr.bf16.vlgmr.msra.gmra.mrb[0].mxu1 %v1241_v26 }
 0x2ce   : > { %v1473_v27 = vpop.f32.mrb[8].mxu0 }
 0x2cf   : > { %v1659_v46 = vpop.f32.mrb[9].mxu0 }
 0x2d0   : > { %v1476_v43 = vpop.f32.mrb[10].mxu0 }
 0x2d1   : > { %v1660_v44 = vpop.f32.mrb[11].mxu0 }
 0x361   : > { %v1630_v49 = vpop.f32.mrb[0].mxu1 }
 0x362   : > { %v1631_v51 = vpop.f32.mrb[1].mxu1 }
 0x363   : > { %v1632_v52 = vadd.f32 %v1631_v51, %v1630_v49  ;;  %v1633_v0 = vpop.f32.mrb[2].mxu1 }
 0x364   : > { %v1634_v53 = vpop.f32.mrb[3].mxu1 }
 0x365   : > { %v1433_v14 = vadd.f32 %v1632_v52, %v1581_v50  ;;  %v1635_v15 = vadd.f32 %v1634_v53, %v1633_v0 }
 0x367   : > { %v1474_v16 = vadd.f32 %v1473_v27, %v1433_v14  ;;  %v1436_v55 = vadd.f32 %v1635_v15, %v1581_v50 }
 0x369   : > { %1480 = vst [vmem:[%s217_s30] sm:$0xff] %v1474_v16  ;;  %v1477_v56 = vadd.f32 %v1476_v43, %v1436_v55 }
 0x36b   : > { %1481 = vst [vmem:[%s217_s30 + $0x8] sm:$0xff] %v1477_v56 }
 0x36c   : > { %1764 = shalt.err (!%p1761_p3)
}
 0x36d   : > { %s1765_s25 = scalar_lea.hbm %s2415_s10, 256  ;;  %s1769_s17 = scalar_lea.hbm %s2464_s5, 512 }
 0x36e   : > { %p1766_p4 = scmp.ne.s32.totalorder %s2415_s10, %s1765_s25  ;;  %p1770_p9 = scmp.lt.u32.totalorder %s2415_s10, %s2464_s5 }
 0x36f   : > { %p1771_p10 = scmp.lt.u32.totalorder %s1769_s17, %s1765_s25  ;;  %p1773_p12 = scmp.lt.u32.totalorder %s1765_s25, %s2415_s10 }
 0x370   : > { %p1767_p7 = pnand %p1766_p4, %p1905_p5 }
 0x371   : > { %p1772_p11 = por %p1771_p10, %p1770_p9 }
 0x372   : > { %p1768_p8 = pneg %p1767_p7 }
 0x373   : > { %p1774_p13 = por %p1773_p12, %p1772_p11 }
 0x375   : > { %p1775_p0 = pnand %p1774_p13, %p1768_p8 }
 0x377   : > { %1778 = shalt.err (!%p1775_p0)
}
 0x378   : > { %s1836_s7 = smov 128  }
 0x379   : > { %1663 = dma.vmem_to_hbm [thread:$0]  (%p1905_p5), %s2410_s6, 256, %s2415_s10, %s2417_s12, %s1836_s7, %s1836_s7, %s1816_s11  }
 0x37a PF: > { %p1669_p1 = scmp.ge.s32.totalorder %s1813_s21, 2  ;;  %s1511_s8 = sand.u32 1, %s1801_s18  }
 0x37b   : > { %s1512_s9 = scalar_lea.sflag [#allocation4], %s1511_s8 }
 0x37c   : > { %p1666_p2 = pnand %p1669_p1, %p1909_p6 }
 0x37e   : > { %1796 = dma.done.wait (!%p1666_p2), %s1512_s9, 256  }
 0x37f   : > { %1798 = vsyncadd (!%p1666_p2), %s1512_s9, 4294967040  ;;  %p15_p3 = scmp.ge.s32.totalorder %s1892_s24, 4   ;;  %s2471_s18 = smov %s1805_s19 }
 0x380   : > { %s2472_s19 = smov %s1809_s20  ;;  %s2473_s20 = smov %s1903_s27 }
 0x381   : > { %s2474_s21 = smov %s1892_s24  ;;  %17 = sbr.rel (!%p15_p3) target bundleno = 3 (0x3), region = 81 }
 0x388   :  { %1517 = vsyncpa [#allocation4], 1 }
 0x389   :  { %1519 = vsyncpa [#allocation4 + $0x1], 1 }

</bundles_post_ra>
